<compile_context>
chip_gen: v6e
topology: v6e:2x2x1
jax: 0.10.0
libtpu: 0.0.40
codegen_flags: <defaults>
</compile_context>

<pallas_src>
import functools
import math

import jax
import jax.numpy as jnp
from jax.experimental import pallas as pl
from jax.experimental.pallas import tpu as pltpu


# ----------------------------------------------------------------------------
# In-kernel helpers
# ----------------------------------------------------------------------------
def _layernorm(x, g_ref, b_ref, eps=1e-5):
    mean = jnp.mean(x, axis=-1, keepdims=True)
    var = jnp.mean((x - mean) ** 2, axis=-1, keepdims=True)
    return (x - mean) * jax.lax.rsqrt(var + eps) * g_ref[...] + b_ref[...]


# ----------------------------------------------------------------------------
# Fused encoder kernel: one grid step == one batch element
# ----------------------------------------------------------------------------
def encoder_kernel(x_ref, mask_ref,
                   w_qkv_ref, b_qkv_ref, wm_ref, bm_ref,
                   g1_ref, be1_ref, w1_ref, b1_ref, w2_ref, b2_ref,
                   g2_ref, be2_ref,
                   out_ref, *, head, head_size, hidden):
    x = x_ref[0]                # (N, D)
    mask_row = mask_ref[0]      # (1, N), 1.0 == masked
    N = x.shape[0]
    D = hidden
    hs = head_size
    scale = 1.0 / math.sqrt(hs)

    # --- multi-head attention -------------------------------------------------
    # Fused Q/K/V projection: a single (N, 3D) matmul + bias.
    qkv = jnp.dot(x, w_qkv_ref[...], preferred_element_type=jnp.float32) + b_qkv_ref[...]
    q = qkv[:, 0:D] * scale     # fold 1/sqrt(head_size) once (instead of per head)
    k = qkv[:, D:2 * D]
    v = qkv[:, 2 * D:3 * D]

    # Hoist mask compare + broadcast out of the per-head loop.
    masked = jnp.broadcast_to(mask_row > 0.5, (N, N))

    wm = wm_ref[...]            # (D, D) merge projection, row-sliced per head
    acc = jnp.zeros((N, D), jnp.float32)
    for h in range(head):       # static unroll over heads
        sl = slice(h * hs, (h + 1) * hs)
        qh = q[:, sl]
        kh = k[:, sl]
        vh = v[:, sl]
        # contract last dims directly (no explicit XLU transpose of kh)
        scores = jax.lax.dot_general(
            qh, kh, (((1,), (1,)), ((), ())),
            preferred_element_type=jnp.float32)               # (N, N)
        scores = jnp.where(masked, -65504.0, scores)
        # explicit softmax
        m = jnp.max(scores, axis=-1, keepdims=True)
        e = jnp.exp(scores - m)
        s = jnp.sum(e, axis=-1, keepdims=True)
        p = e * pl.reciprocal(s, approx=False)
        att_h = jnp.dot(p, vh, preferred_element_type=jnp.float32)   # (N, hs)
        # fold the merge projection into a per-head accumulation
        # (removes the lane-axis concatenate of head outputs)
        acc = acc + jnp.dot(att_h, wm[sl, :], preferred_element_type=jnp.float32)
    att = acc + bm_ref[...]     # dropout = identity (eval)

    # --- residual + LayerNorm + FFN + residual + LayerNorm --------------------
    h1 = _layernorm(x + att, g1_ref, be1_ref)
    f = jnp.maximum(
        jnp.dot(h1, w1_ref[...], preferred_element_type=jnp.float32) + b1_ref[...], 0.0)
    ffn = jnp.dot(f, w2_ref[...], preferred_element_type=jnp.float32) + b2_ref[...]
    out_ref[0] = _layernorm(h1 + ffn, g2_ref, be2_ref)


# ----------------------------------------------------------------------------
# Wrapper
# ----------------------------------------------------------------------------
def encoder_forward(x, mask, params, head=8):
    B, N, D = x.shape
    head_size = D // head
    (wq, bq, wk, bk, wv, bv, wm, bm,
     g1, be1, w1, b1, w2, b2, g2, be2) = params
    # Fuse Q/K/V weights once in the wrapper (one-time XLA concat).
    w_qkv = jnp.concatenate([wq, wk, wv], axis=1)   # (D, 3D)
    b_qkv = jnp.concatenate([bq, bk, bv], axis=1)   # (1, 3D)
    fused = (w_qkv, b_qkv, wm, bm, g1, be1, w1, b1, w2, b2, g2, be2)

    kernel = functools.partial(encoder_kernel, head=head,
                               head_size=head_size, hidden=D)
    in_specs = [pl.BlockSpec((1, N, D), lambda b: (b, 0, 0)),
                pl.BlockSpec((1, 1, N), lambda b: (b, 0, 0))]
    in_specs += [pl.BlockSpec(p.shape, lambda b: (0, 0)) for p in fused]

    return pl.pallas_call(
        kernel,
        out_shape=jax.ShapeDtypeStruct((B, N, D), jnp.float32),
        grid=(B,),
        in_specs=in_specs,
        out_specs=pl.BlockSpec((1, N, D), lambda b: (b, 0, 0)),
        compiler_params=pltpu.CompilerParams(
            dimension_semantics=("parallel",)),
    )(x, mask, *fused)


# ----------------------------------------------------------------------------
# Deterministic parameter init (weights stored as (in, out); bias as (1, out))
# ----------------------------------------------------------------------------
def _init_linear(key, din, dout):
    kw, kb = jax.random.split(key)
    w = jax.random.normal(kw, (din, dout), jnp.float32) * 0.05
    b = jax.random.normal(kb, (1, dout), jnp.float32) * 0.05
    return w, b


def _init_ln(dim):
    return jnp.ones((1, dim), jnp.float32), jnp.zeros((1, dim), jnp.float32)


def init_encoder_params(key, dim):
    k1, k2, k3, k4, k5, k6 = jax.random.split(key, 6)
    wq, bq = _init_linear(k1, dim, dim)
    wk, bk = _init_linear(k2, dim, dim)
    wv, bv = _init_linear(k3, dim, dim)
    wm, bm = _init_linear(k4, dim, dim)
    g1, be1 = _init_ln(dim)
    w1, b1 = _init_linear(k5, dim, dim * 2)
    w2, b2 = _init_linear(k6, dim * 2, dim)
    g2, be2 = _init_ln(dim)
    return (wq, bq, wk, bk, wv, bv, wm, bm,
            g1, be1, w1, b1, w2, b2, g2, be2)


# ----------------------------------------------------------------------------
# Pure-JAX reference (mirrors the PyTorch forward, dropout = identity)
# ----------------------------------------------------------------------------
def _ref_linear(x, w, b):
    return x @ w + b


def _ref_ln(x, g, b, eps=1e-5):
    m = x.mean(-1, keepdims=True)
    v = ((x - m) ** 2).mean(-1, keepdims=True)
    return (x - m) / jnp.sqrt(v + eps) * g + b


def _ref_mha(xq, xkv, mask, p, head, hs):
    wq, bq, wk, bk, wv, bv, wm, bm = p
    B, Nq, D = xq.shape
    Nk = xkv.shape[1]
    q = _ref_linear(xq, wq, bq).reshape(B, Nq, head, hs).transpose(0, 2, 1, 3)
    k = _ref_linear(xkv, wk, bk).reshape(B, Nk, head, hs).transpose(0, 2, 1, 3)
    v = _ref_linear(xkv, wv, bv).reshape(B, Nk, head, hs).transpose(0, 2, 1, 3)
    scores = jnp.einsum('bhqd,bhkd->bhqk', q, k) / math.sqrt(hs)
    scores = jnp.where(mask[:, None, :, :] > 0.5, -65504.0, scores)
    att = jax.nn.softmax(scores, axis=-1)
    o = jnp.einsum('bhqk,bhkd->bhqd', att, v).transpose(0, 2, 1, 3).reshape(B, Nq, D)
    return _ref_linear(o, wm, bm)


def ref_encoder(x, mask, p, head):
    hs = x.shape[-1] // head
    att = _ref_mha(x, x, mask, p[0:8], head, hs)
    h1 = _ref_ln(x + att, p[8], p[9])
    f = jnp.maximum(_ref_linear(h1, p[10], p[11]), 0.0)
    ffn = _ref_linear(f, p[12], p[13])
    return _ref_ln(h1 + ffn, p[14], p[15])


# ----------------------------------------------------------------------------
if __name__ == "__main__":
    B = 2
    HIDDEN = 32          # hidden_dim (small synthetic size; head_size = 32 // 8 = 4)
    HEAD = 8
    N = 8                # sequence length

    key = jax.random.PRNGKey(0)
    kx, km, kp = jax.random.split(key, 3)

    x = jax.random.normal(kx, (B, N, HIDDEN), jnp.float32)
    # mask: 1.0 == masked-out key position (broadcast over query rows)
    x_mask = (jax.random.uniform(km, (B, 1, N)) < 0.25).astype(jnp.float32)

    enc_params = init_encoder_params(kp, HIDDEN)

    out = encoder_forward(x, x_mask, enc_params, head=HEAD)
    out = jax.block_until_ready(out)

    ref = ref_encoder(x, x_mask, enc_params, head=HEAD)

    assert out.shape == ref.shape and out.dtype == jnp.float32
    assert jnp.allclose(out, ref, atol=3e-4, rtol=3e-4), float(jnp.max(jnp.abs(out - ref)))

    print("KERNEL_OK")
</pallas_src>

<mosaic_0001>
module attributes {stable_mosaic.version = 11 : i64} {
  func.func @encoder_kernel(%arg0: i32, %arg1: memref<1x8x32xf32, #tpu.memory_space<vmem>>, %arg2: memref<1x1x8xf32, #tpu.memory_space<vmem>>, %arg3: memref<32x96xf32, #tpu.memory_space<vmem>>, %arg4: memref<1x96xf32, #tpu.memory_space<vmem>>, %arg5: memref<32x32xf32, #tpu.memory_space<vmem>>, %arg6: memref<1x32xf32, #tpu.memory_space<vmem>>, %arg7: memref<1x32xf32, #tpu.memory_space<vmem>>, %arg8: memref<1x32xf32, #tpu.memory_space<vmem>>, %arg9: memref<32x64xf32, #tpu.memory_space<vmem>>, %arg10: memref<1x64xf32, #tpu.memory_space<vmem>>, %arg11: memref<64x32xf32, #tpu.memory_space<vmem>>, %arg12: memref<1x32xf32, #tpu.memory_space<vmem>>, %arg13: memref<1x32xf32, #tpu.memory_space<vmem>>, %arg14: memref<1x32xf32, #tpu.memory_space<vmem>>, %arg15: memref<1x8x32xf32, #tpu.memory_space<vmem>>) attributes {dimension_semantics = [#tpu.dimension_semantics<parallel>], iteration_bounds = array<i64: 2>, scalar_prefetch = 0 : i64, scratch_operands = 0 : i64, tpu.core_type = #tpu.core_type<tc>, window_params = [{transform_indices = @transform_0, window_bounds = array<i64: 1, 8, 32>}, {transform_indices = @transform_1, window_bounds = array<i64: 1, 1, 8>}, {pipeline_mode = #tpu.pipeline_mode<synchronous>, transform_indices = @transform_2, window_bounds = array<i64: 32, 96>}, {pipeline_mode = #tpu.pipeline_mode<synchronous>, transform_indices = @transform_3, window_bounds = array<i64: 1, 96>}, {pipeline_mode = #tpu.pipeline_mode<synchronous>, transform_indices = @transform_4, window_bounds = array<i64: 32, 32>}, {pipeline_mode = #tpu.pipeline_mode<synchronous>, transform_indices = @transform_5, window_bounds = array<i64: 1, 32>}, {pipeline_mode = #tpu.pipeline_mode<synchronous>, transform_indices = @transform_6, window_bounds = array<i64: 1, 32>}, {pipeline_mode = #tpu.pipeline_mode<synchronous>, transform_indices = @transform_7, window_bounds = array<i64: 1, 32>}, {pipeline_mode = #tpu.pipeline_mode<synchronous>, transform_indices = @transform_8, window_bounds = array<i64: 32, 64>}, {pipeline_mode = #tpu.pipeline_mode<synchronous>, transform_indices = @transform_9, window_bounds = array<i64: 1, 64>}, {pipeline_mode = #tpu.pipeline_mode<synchronous>, transform_indices = @transform_10, window_bounds = array<i64: 64, 32>}, {pipeline_mode = #tpu.pipeline_mode<synchronous>, transform_indices = @transform_11, window_bounds = array<i64: 1, 32>}, {pipeline_mode = #tpu.pipeline_mode<synchronous>, transform_indices = @transform_12, window_bounds = array<i64: 1, 32>}, {pipeline_mode = #tpu.pipeline_mode<synchronous>, transform_indices = @transform_13, window_bounds = array<i64: 1, 32>}, {transform_indices = @transform_14, window_bounds = array<i64: 1, 8, 32>}]} {
    %c0 = arith.constant 0 : index
    %c0_0 = arith.constant 0 : index
    %c0_1 = arith.constant 0 : index
    %0 = vector.load %arg1[%c0, %c0_0, %c0_1] : memref<1x8x32xf32, #tpu.memory_space<vmem>>, vector<1x8x32xf32>
    %1 = vector.shape_cast %0 : vector<1x8x32xf32> to vector<8x32xf32>
    %c0_2 = arith.constant 0 : index
    %c0_3 = arith.constant 0 : index
    %c0_4 = arith.constant 0 : index
    %2 = vector.load %arg2[%c0_2, %c0_3, %c0_4] : memref<1x1x8xf32, #tpu.memory_space<vmem>>, vector<1x1x8xf32>
    %3 = vector.shape_cast %2 : vector<1x1x8xf32> to vector<1x8xf32>
    %c0_5 = arith.constant 0 : index
    %c0_6 = arith.constant 0 : index
    %4 = vector.load %arg3[%c0_5, %c0_6] : memref<32x96xf32, #tpu.memory_space<vmem>>, vector<32x96xf32>
    %cst = arith.constant dense<0.000000e+00> : vector<8x96xf32>
    %5 = tpu.matmul %1, %4, %cst {dimension_numbers = #tpu.dot_dimension_numbers<[1], [0], [0], [1], [0, 0, 1, 1], [], []>} : vector<8x32xf32>, vector<32x96xf32>, vector<8x96xf32> -> vector<8x96xf32>
    %c0_7 = arith.constant 0 : index
    %c0_8 = arith.constant 0 : index
    %6 = vector.load %arg4[%c0_7, %c0_8] : memref<1x96xf32, #tpu.memory_space<vmem>>, vector<1x96xf32>
    %7 = vector.broadcast %6 : vector<1x96xf32> to vector<8x96xf32>
    %8 = arith.addf %5, %7 : vector<8x96xf32>
    %9 = vector.extract_strided_slice %8 {offsets = [0, 0], sizes = [8, 32], strides = [1, 1]} : vector<8x96xf32> to vector<8x32xf32>
    %cst_9 = arith.constant 5.000000e-01 : f32
    %10 = vector.broadcast %cst_9 : f32 to vector<8x32xf32>
    %11 = arith.mulf %9, %10 : vector<8x32xf32>
    %12 = vector.extract_strided_slice %8 {offsets = [0, 32], sizes = [8, 32], strides = [1, 1]} : vector<8x96xf32> to vector<8x32xf32>
    %13 = vector.extract_strided_slice %8 {offsets = [0, 64], sizes = [8, 32], strides = [1, 1]} : vector<8x96xf32> to vector<8x32xf32>
    %cst_10 = arith.constant 5.000000e-01 : f32
    %14 = vector.broadcast %cst_10 : f32 to vector<1x8xf32>
    %15 = arith.cmpf ogt, %3, %14 : vector<1x8xf32>
    %16 = vector.shape_cast %15 : vector<1x8xi1> to vector<1x8xi1>
    %17 = vector.broadcast %16 : vector<1x8xi1> to vector<8x8xi1>
    %c0_11 = arith.constant 0 : index
    %c0_12 = arith.constant 0 : index
    %18 = vector.load %arg5[%c0_11, %c0_12] : memref<32x32xf32, #tpu.memory_space<vmem>>, vector<32x32xf32>
    %cst_13 = arith.constant 0.000000e+00 : f32
    %19 = vector.broadcast %cst_13 : f32 to vector<8x32xf32>
    %20 = vector.extract_strided_slice %11 {offsets = [0, 0], sizes = [8, 4], strides = [1, 1]} : vector<8x32xf32> to vector<8x4xf32>
    %21 = vector.extract_strided_slice %12 {offsets = [0, 0], sizes = [8, 4], strides = [1, 1]} : vector<8x32xf32> to vector<8x4xf32>
    %22 = vector.extract_strided_slice %13 {offsets = [0, 0], sizes = [8, 4], strides = [1, 1]} : vector<8x32xf32> to vector<8x4xf32>
    %cst_14 = arith.constant dense<0.000000e+00> : vector<8x8xf32>
    %23 = tpu.matmul %20, %21, %cst_14 {dimension_numbers = #tpu.dot_dimension_numbers<[1], [1], [0], [0], [0, 0, 1, 0], [], []>} : vector<8x4xf32>, vector<8x4xf32>, vector<8x8xf32> -> vector<8x8xf32>
    %cst_15 = arith.constant -6.550400e+04 : f32
    %24 = vector.broadcast %cst_15 : f32 to vector<8x8xf32>
    %25 = arith.select %17, %24, %23 : vector<8x8xi1>, vector<8x8xf32>
    %cst_16 = arith.constant dense<0xFF800000> : vector<8xf32>
    %26 = vector.multi_reduction <maximumf>, %25, %cst_16 [1] : vector<8x8xf32> to vector<8xf32>
    %27 = vector.shape_cast %26 : vector<8xf32> to vector<8x1xf32>
    %28 = vector.broadcast %27 : vector<8x1xf32> to vector<8x8xf32>
    %29 = arith.subf %25, %28 : vector<8x8xf32>
    %30 = math.exp %29 : vector<8x8xf32>
    %cst_17 = arith.constant dense<0.000000e+00> : vector<8xf32>
    %31 = vector.multi_reduction <add>, %30, %cst_17 [1] : vector<8x8xf32> to vector<8xf32>
    %32 = vector.shape_cast %31 : vector<8xf32> to vector<8x1xf32>
    %33 = tpu.reciprocal %32 : vector<8x1xf32> -> vector<8x1xf32>
    %34 = vector.broadcast %33 : vector<8x1xf32> to vector<8x8xf32>
    %35 = arith.mulf %30, %34 : vector<8x8xf32>
    %cst_18 = arith.constant dense<0.000000e+00> : vector<8x4xf32>
    %36 = tpu.matmul %35, %22, %cst_18 {dimension_numbers = #tpu.dot_dimension_numbers<[1], [0], [0], [1], [0, 0, 1, 1], [], []>} : vector<8x8xf32>, vector<8x4xf32>, vector<8x4xf32> -> vector<8x4xf32>
    %37 = vector.extract_strided_slice %18 {offsets = [0, 0], sizes = [4, 32], strides = [1, 1]} : vector<32x32xf32> to vector<4x32xf32>
    %cst_19 = arith.constant dense<0.000000e+00> : vector<8x32xf32>
    %38 = tpu.matmul %36, %37, %cst_19 {dimension_numbers = #tpu.dot_dimension_numbers<[1], [0], [0], [1], [0, 0, 1, 1], [], []>} : vector<8x4xf32>, vector<4x32xf32>, vector<8x32xf32> -> vector<8x32xf32>
    %39 = arith.addf %19, %38 : vector<8x32xf32>
    %40 = vector.extract_strided_slice %11 {offsets = [0, 4], sizes = [8, 4], strides = [1, 1]} : vector<8x32xf32> to vector<8x4xf32>
    %41 = vector.extract_strided_slice %12 {offsets = [0, 4], sizes = [8, 4], strides = [1, 1]} : vector<8x32xf32> to vector<8x4xf32>
    %42 = vector.extract_strided_slice %13 {offsets = [0, 4], sizes = [8, 4], strides = [1, 1]} : vector<8x32xf32> to vector<8x4xf32>
    %cst_20 = arith.constant dense<0.000000e+00> : vector<8x8xf32>
    %43 = tpu.matmul %40, %41, %cst_20 {dimension_numbers = #tpu.dot_dimension_numbers<[1], [1], [0], [0], [0, 0, 1, 0], [], []>} : vector<8x4xf32>, vector<8x4xf32>, vector<8x8xf32> -> vector<8x8xf32>
    %cst_21 = arith.constant -6.550400e+04 : f32
    %44 = vector.broadcast %cst_21 : f32 to vector<8x8xf32>
    %45 = arith.select %17, %44, %43 : vector<8x8xi1>, vector<8x8xf32>
    %cst_22 = arith.constant dense<0xFF800000> : vector<8xf32>
    %46 = vector.multi_reduction <maximumf>, %45, %cst_22 [1] : vector<8x8xf32> to vector<8xf32>
    %47 = vector.shape_cast %46 : vector<8xf32> to vector<8x1xf32>
    %48 = vector.broadcast %47 : vector<8x1xf32> to vector<8x8xf32>
    %49 = arith.subf %45, %48 : vector<8x8xf32>
    %50 = math.exp %49 : vector<8x8xf32>
    %cst_23 = arith.constant dense<0.000000e+00> : vector<8xf32>
    %51 = vector.multi_reduction <add>, %50, %cst_23 [1] : vector<8x8xf32> to vector<8xf32>
    %52 = vector.shape_cast %51 : vector<8xf32> to vector<8x1xf32>
    %53 = tpu.reciprocal %52 : vector<8x1xf32> -> vector<8x1xf32>
    %54 = vector.broadcast %53 : vector<8x1xf32> to vector<8x8xf32>
    %55 = arith.mulf %50, %54 : vector<8x8xf32>
    %cst_24 = arith.constant dense<0.000000e+00> : vector<8x4xf32>
    %56 = tpu.matmul %55, %42, %cst_24 {dimension_numbers = #tpu.dot_dimension_numbers<[1], [0], [0], [1], [0, 0, 1, 1], [], []>} : vector<8x8xf32>, vector<8x4xf32>, vector<8x4xf32> -> vector<8x4xf32>
    %57 = vector.extract_strided_slice %18 {offsets = [4, 0], sizes = [4, 32], strides = [1, 1]} : vector<32x32xf32> to vector<4x32xf32>
    %cst_25 = arith.constant dense<0.000000e+00> : vector<8x32xf32>
    %58 = tpu.matmul %56, %57, %cst_25 {dimension_numbers = #tpu.dot_dimension_numbers<[1], [0], [0], [1], [0, 0, 1, 1], [], []>} : vector<8x4xf32>, vector<4x32xf32>, vector<8x32xf32> -> vector<8x32xf32>
    %59 = arith.addf %39, %58 : vector<8x32xf32>
    %60 = vector.extract_strided_slice %11 {offsets = [0, 8], sizes = [8, 4], strides = [1, 1]} : vector<8x32xf32> to vector<8x4xf32>
    %61 = vector.extract_strided_slice %12 {offsets = [0, 8], sizes = [8, 4], strides = [1, 1]} : vector<8x32xf32> to vector<8x4xf32>
    %62 = vector.extract_strided_slice %13 {offsets = [0, 8], sizes = [8, 4], strides = [1, 1]} : vector<8x32xf32> to vector<8x4xf32>
    %cst_26 = arith.constant dense<0.000000e+00> : vector<8x8xf32>
    %63 = tpu.matmul %60, %61, %cst_26 {dimension_numbers = #tpu.dot_dimension_numbers<[1], [1], [0], [0], [0, 0, 1, 0], [], []>} : vector<8x4xf32>, vector<8x4xf32>, vector<8x8xf32> -> vector<8x8xf32>
    %cst_27 = arith.constant -6.550400e+04 : f32
    %64 = vector.broadcast %cst_27 : f32 to vector<8x8xf32>
    %65 = arith.select %17, %64, %63 : vector<8x8xi1>, vector<8x8xf32>
    %cst_28 = arith.constant dense<0xFF800000> : vector<8xf32>
    %66 = vector.multi_reduction <maximumf>, %65, %cst_28 [1] : vector<8x8xf32> to vector<8xf32>
    %67 = vector.shape_cast %66 : vector<8xf32> to vector<8x1xf32>
    %68 = vector.broadcast %67 : vector<8x1xf32> to vector<8x8xf32>
    %69 = arith.subf %65, %68 : vector<8x8xf32>
    %70 = math.exp %69 : vector<8x8xf32>
    %cst_29 = arith.constant dense<0.000000e+00> : vector<8xf32>
    %71 = vector.multi_reduction <add>, %70, %cst_29 [1] : vector<8x8xf32> to vector<8xf32>
    %72 = vector.shape_cast %71 : vector<8xf32> to vector<8x1xf32>
    %73 = tpu.reciprocal %72 : vector<8x1xf32> -> vector<8x1xf32>
    %74 = vector.broadcast %73 : vector<8x1xf32> to vector<8x8xf32>
    %75 = arith.mulf %70, %74 : vector<8x8xf32>
    %cst_30 = arith.constant dense<0.000000e+00> : vector<8x4xf32>
    %76 = tpu.matmul %75, %62, %cst_30 {dimension_numbers = #tpu.dot_dimension_numbers<[1], [0], [0], [1], [0, 0, 1, 1], [], []>} : vector<8x8xf32>, vector<8x4xf32>, vector<8x4xf32> -> vector<8x4xf32>
    %77 = vector.extract_strided_slice %18 {offsets = [8, 0], sizes = [4, 32], strides = [1, 1]} : vector<32x32xf32> to vector<4x32xf32>
    %cst_31 = arith.constant dense<0.000000e+00> : vector<8x32xf32>
    %78 = tpu.matmul %76, %77, %cst_31 {dimension_numbers = #tpu.dot_dimension_numbers<[1], [0], [0], [1], [0, 0, 1, 1], [], []>} : vector<8x4xf32>, vector<4x32xf32>, vector<8x32xf32> -> vector<8x32xf32>
    %79 = arith.addf %59, %78 : vector<8x32xf32>
    %80 = vector.extract_strided_slice %11 {offsets = [0, 12], sizes = [8, 4], strides = [1, 1]} : vector<8x32xf32> to vector<8x4xf32>
    %81 = vector.extract_strided_slice %12 {offsets = [0, 12], sizes = [8, 4], strides = [1, 1]} : vector<8x32xf32> to vector<8x4xf32>
    %82 = vector.extract_strided_slice %13 {offsets = [0, 12], sizes = [8, 4], strides = [1, 1]} : vector<8x32xf32> to vector<8x4xf32>
    %cst_32 = arith.constant dense<0.000000e+00> : vector<8x8xf32>
    %83 = tpu.matmul %80, %81, %cst_32 {dimension_numbers = #tpu.dot_dimension_numbers<[1], [1], [0], [0], [0, 0, 1, 0], [], []>} : vector<8x4xf32>, vector<8x4xf32>, vector<8x8xf32> -> vector<8x8xf32>
    %cst_33 = arith.constant -6.550400e+04 : f32
    %84 = vector.broadcast %cst_33 : f32 to vector<8x8xf32>
    %85 = arith.select %17, %84, %83 : vector<8x8xi1>, vector<8x8xf32>
    %cst_34 = arith.constant dense<0xFF800000> : vector<8xf32>
    %86 = vector.multi_reduction <maximumf>, %85, %cst_34 [1] : vector<8x8xf32> to vector<8xf32>
    %87 = vector.shape_cast %86 : vector<8xf32> to vector<8x1xf32>
    %88 = vector.broadcast %87 : vector<8x1xf32> to vector<8x8xf32>
    %89 = arith.subf %85, %88 : vector<8x8xf32>
    %90 = math.exp %89 : vector<8x8xf32>
    %cst_35 = arith.constant dense<0.000000e+00> : vector<8xf32>
    %91 = vector.multi_reduction <add>, %90, %cst_35 [1] : vector<8x8xf32> to vector<8xf32>
    %92 = vector.shape_cast %91 : vector<8xf32> to vector<8x1xf32>
    %93 = tpu.reciprocal %92 : vector<8x1xf32> -> vector<8x1xf32>
    %94 = vector.broadcast %93 : vector<8x1xf32> to vector<8x8xf32>
    %95 = arith.mulf %90, %94 : vector<8x8xf32>
    %cst_36 = arith.constant dense<0.000000e+00> : vector<8x4xf32>
    %96 = tpu.matmul %95, %82, %cst_36 {dimension_numbers = #tpu.dot_dimension_numbers<[1], [0], [0], [1], [0, 0, 1, 1], [], []>} : vector<8x8xf32>, vector<8x4xf32>, vector<8x4xf32> -> vector<8x4xf32>
    %97 = vector.extract_strided_slice %18 {offsets = [12, 0], sizes = [4, 32], strides = [1, 1]} : vector<32x32xf32> to vector<4x32xf32>
    %cst_37 = arith.constant dense<0.000000e+00> : vector<8x32xf32>
    %98 = tpu.matmul %96, %97, %cst_37 {dimension_numbers = #tpu.dot_dimension_numbers<[1], [0], [0], [1], [0, 0, 1, 1], [], []>} : vector<8x4xf32>, vector<4x32xf32>, vector<8x32xf32> -> vector<8x32xf32>
    %99 = arith.addf %79, %98 : vector<8x32xf32>
    %100 = vector.extract_strided_slice %11 {offsets = [0, 16], sizes = [8, 4], strides = [1, 1]} : vector<8x32xf32> to vector<8x4xf32>
    %101 = vector.extract_strided_slice %12 {offsets = [0, 16], sizes = [8, 4], strides = [1, 1]} : vector<8x32xf32> to vector<8x4xf32>
    %102 = vector.extract_strided_slice %13 {offsets = [0, 16], sizes = [8, 4], strides = [1, 1]} : vector<8x32xf32> to vector<8x4xf32>
    %cst_38 = arith.constant dense<0.000000e+00> : vector<8x8xf32>
    %103 = tpu.matmul %100, %101, %cst_38 {dimension_numbers = #tpu.dot_dimension_numbers<[1], [1], [0], [0], [0, 0, 1, 0], [], []>} : vector<8x4xf32>, vector<8x4xf32>, vector<8x8xf32> -> vector<8x8xf32>
    %cst_39 = arith.constant -6.550400e+04 : f32
    %104 = vector.broadcast %cst_39 : f32 to vector<8x8xf32>
    %105 = arith.select %17, %104, %103 : vector<8x8xi1>, vector<8x8xf32>
    %cst_40 = arith.constant dense<0xFF800000> : vector<8xf32>
    %106 = vector.multi_reduction <maximumf>, %105, %cst_40 [1] : vector<8x8xf32> to vector<8xf32>
    %107 = vector.shape_cast %106 : vector<8xf32> to vector<8x1xf32>
    %108 = vector.broadcast %107 : vector<8x1xf32> to vector<8x8xf32>
    %109 = arith.subf %105, %108 : vector<8x8xf32>
    %110 = math.exp %109 : vector<8x8xf32>
    %cst_41 = arith.constant dense<0.000000e+00> : vector<8xf32>
    %111 = vector.multi_reduction <add>, %110, %cst_41 [1] : vector<8x8xf32> to vector<8xf32>
    %112 = vector.shape_cast %111 : vector<8xf32> to vector<8x1xf32>
    %113 = tpu.reciprocal %112 : vector<8x1xf32> -> vector<8x1xf32>
    %114 = vector.broadcast %113 : vector<8x1xf32> to vector<8x8xf32>
    %115 = arith.mulf %110, %114 : vector<8x8xf32>
    %cst_42 = arith.constant dense<0.000000e+00> : vector<8x4xf32>
    %116 = tpu.matmul %115, %102, %cst_42 {dimension_numbers = #tpu.dot_dimension_numbers<[1], [0], [0], [1], [0, 0, 1, 1], [], []>} : vector<8x8xf32>, vector<8x4xf32>, vector<8x4xf32> -> vector<8x4xf32>
    %117 = vector.extract_strided_slice %18 {offsets = [16, 0], sizes = [4, 32], strides = [1, 1]} : vector<32x32xf32> to vector<4x32xf32>
    %cst_43 = arith.constant dense<0.000000e+00> : vector<8x32xf32>
    %118 = tpu.matmul %116, %117, %cst_43 {dimension_numbers = #tpu.dot_dimension_numbers<[1], [0], [0], [1], [0, 0, 1, 1], [], []>} : vector<8x4xf32>, vector<4x32xf32>, vector<8x32xf32> -> vector<8x32xf32>
    %119 = arith.addf %99, %118 : vector<8x32xf32>
    %120 = vector.extract_strided_slice %11 {offsets = [0, 20], sizes = [8, 4], strides = [1, 1]} : vector<8x32xf32> to vector<8x4xf32>
    %121 = vector.extract_strided_slice %12 {offsets = [0, 20], sizes = [8, 4], strides = [1, 1]} : vector<8x32xf32> to vector<8x4xf32>
    %122 = vector.extract_strided_slice %13 {offsets = [0, 20], sizes = [8, 4], strides = [1, 1]} : vector<8x32xf32> to vector<8x4xf32>
    %cst_44 = arith.constant dense<0.000000e+00> : vector<8x8xf32>
    %123 = tpu.matmul %120, %121, %cst_44 {dimension_numbers = #tpu.dot_dimension_numbers<[1], [1], [0], [0], [0, 0, 1, 0], [], []>} : vector<8x4xf32>, vector<8x4xf32>, vector<8x8xf32> -> vector<8x8xf32>
    %cst_45 = arith.constant -6.550400e+04 : f32
    %124 = vector.broadcast %cst_45 : f32 to vector<8x8xf32>
    %125 = arith.select %17, %124, %123 : vector<8x8xi1>, vector<8x8xf32>
    %cst_46 = arith.constant dense<0xFF800000> : vector<8xf32>
    %126 = vector.multi_reduction <maximumf>, %125, %cst_46 [1] : vector<8x8xf32> to vector<8xf32>
    %127 = vector.shape_cast %126 : vector<8xf32> to vector<8x1xf32>
    %128 = vector.broadcast %127 : vector<8x1xf32> to vector<8x8xf32>
    %129 = arith.subf %125, %128 : vector<8x8xf32>
    %130 = math.exp %129 : vector<8x8xf32>
    %cst_47 = arith.constant dense<0.000000e+00> : vector<8xf32>
    %131 = vector.multi_reduction <add>, %130, %cst_47 [1] : vector<8x8xf32> to vector<8xf32>
    %132 = vector.shape_cast %131 : vector<8xf32> to vector<8x1xf32>
    %133 = tpu.reciprocal %132 : vector<8x1xf32> -> vector<8x1xf32>
    %134 = vector.broadcast %133 : vector<8x1xf32> to vector<8x8xf32>
    %135 = arith.mulf %130, %134 : vector<8x8xf32>
    %cst_48 = arith.constant dense<0.000000e+00> : vector<8x4xf32>
    %136 = tpu.matmul %135, %122, %cst_48 {dimension_numbers = #tpu.dot_dimension_numbers<[1], [0], [0], [1], [0, 0, 1, 1], [], []>} : vector<8x8xf32>, vector<8x4xf32>, vector<8x4xf32> -> vector<8x4xf32>
    %137 = vector.extract_strided_slice %18 {offsets = [20, 0], sizes = [4, 32], strides = [1, 1]} : vector<32x32xf32> to vector<4x32xf32>
    %cst_49 = arith.constant dense<0.000000e+00> : vector<8x32xf32>
    %138 = tpu.matmul %136, %137, %cst_49 {dimension_numbers = #tpu.dot_dimension_numbers<[1], [0], [0], [1], [0, 0, 1, 1], [], []>} : vector<8x4xf32>, vector<4x32xf32>, vector<8x32xf32> -> vector<8x32xf32>
    %139 = arith.addf %119, %138 : vector<8x32xf32>
    %140 = vector.extract_strided_slice %11 {offsets = [0, 24], sizes = [8, 4], strides = [1, 1]} : vector<8x32xf32> to vector<8x4xf32>
    %141 = vector.extract_strided_slice %12 {offsets = [0, 24], sizes = [8, 4], strides = [1, 1]} : vector<8x32xf32> to vector<8x4xf32>
    %142 = vector.extract_strided_slice %13 {offsets = [0, 24], sizes = [8, 4], strides = [1, 1]} : vector<8x32xf32> to vector<8x4xf32>
    %cst_50 = arith.constant dense<0.000000e+00> : vector<8x8xf32>
    %143 = tpu.matmul %140, %141, %cst_50 {dimension_numbers = #tpu.dot_dimension_numbers<[1], [1], [0], [0], [0, 0, 1, 0], [], []>} : vector<8x4xf32>, vector<8x4xf32>, vector<8x8xf32> -> vector<8x8xf32>
    %cst_51 = arith.constant -6.550400e+04 : f32
    %144 = vector.broadcast %cst_51 : f32 to vector<8x8xf32>
    %145 = arith.select %17, %144, %143 : vector<8x8xi1>, vector<8x8xf32>
    %cst_52 = arith.constant dense<0xFF800000> : vector<8xf32>
    %146 = vector.multi_reduction <maximumf>, %145, %cst_52 [1] : vector<8x8xf32> to vector<8xf32>
    %147 = vector.shape_cast %146 : vector<8xf32> to vector<8x1xf32>
    %148 = vector.broadcast %147 : vector<8x1xf32> to vector<8x8xf32>
    %149 = arith.subf %145, %148 : vector<8x8xf32>
    %150 = math.exp %149 : vector<8x8xf32>
    %cst_53 = arith.constant dense<0.000000e+00> : vector<8xf32>
    %151 = vector.multi_reduction <add>, %150, %cst_53 [1] : vector<8x8xf32> to vector<8xf32>
    %152 = vector.shape_cast %151 : vector<8xf32> to vector<8x1xf32>
    %153 = tpu.reciprocal %152 : vector<8x1xf32> -> vector<8x1xf32>
    %154 = vector.broadcast %153 : vector<8x1xf32> to vector<8x8xf32>
    %155 = arith.mulf %150, %154 : vector<8x8xf32>
    %cst_54 = arith.constant dense<0.000000e+00> : vector<8x4xf32>
    %156 = tpu.matmul %155, %142, %cst_54 {dimension_numbers = #tpu.dot_dimension_numbers<[1], [0], [0], [1], [0, 0, 1, 1], [], []>} : vector<8x8xf32>, vector<8x4xf32>, vector<8x4xf32> -> vector<8x4xf32>
    %157 = vector.extract_strided_slice %18 {offsets = [24, 0], sizes = [4, 32], strides = [1, 1]} : vector<32x32xf32> to vector<4x32xf32>
    %cst_55 = arith.constant dense<0.000000e+00> : vector<8x32xf32>
    %158 = tpu.matmul %156, %157, %cst_55 {dimension_numbers = #tpu.dot_dimension_numbers<[1], [0], [0], [1], [0, 0, 1, 1], [], []>} : vector<8x4xf32>, vector<4x32xf32>, vector<8x32xf32> -> vector<8x32xf32>
    %159 = arith.addf %139, %158 : vector<8x32xf32>
    %160 = vector.extract_strided_slice %11 {offsets = [0, 28], sizes = [8, 4], strides = [1, 1]} : vector<8x32xf32> to vector<8x4xf32>
    %161 = vector.extract_strided_slice %12 {offsets = [0, 28], sizes = [8, 4], strides = [1, 1]} : vector<8x32xf32> to vector<8x4xf32>
    %162 = vector.extract_strided_slice %13 {offsets = [0, 28], sizes = [8, 4], strides = [1, 1]} : vector<8x32xf32> to vector<8x4xf32>
    %cst_56 = arith.constant dense<0.000000e+00> : vector<8x8xf32>
    %163 = tpu.matmul %160, %161, %cst_56 {dimension_numbers = #tpu.dot_dimension_numbers<[1], [1], [0], [0], [0, 0, 1, 0], [], []>} : vector<8x4xf32>, vector<8x4xf32>, vector<8x8xf32> -> vector<8x8xf32>
    %cst_57 = arith.constant -6.550400e+04 : f32
    %164 = vector.broadcast %cst_57 : f32 to vector<8x8xf32>
    %165 = arith.select %17, %164, %163 : vector<8x8xi1>, vector<8x8xf32>
    %cst_58 = arith.constant dense<0xFF800000> : vector<8xf32>
    %166 = vector.multi_reduction <maximumf>, %165, %cst_58 [1] : vector<8x8xf32> to vector<8xf32>
    %167 = vector.shape_cast %166 : vector<8xf32> to vector<8x1xf32>
    %168 = vector.broadcast %167 : vector<8x1xf32> to vector<8x8xf32>
    %169 = arith.subf %165, %168 : vector<8x8xf32>
    %170 = math.exp %169 : vector<8x8xf32>
    %cst_59 = arith.constant dense<0.000000e+00> : vector<8xf32>
    %171 = vector.multi_reduction <add>, %170, %cst_59 [1] : vector<8x8xf32> to vector<8xf32>
    %172 = vector.shape_cast %171 : vector<8xf32> to vector<8x1xf32>
    %173 = tpu.reciprocal %172 : vector<8x1xf32> -> vector<8x1xf32>
    %174 = vector.broadcast %173 : vector<8x1xf32> to vector<8x8xf32>
    %175 = arith.mulf %170, %174 : vector<8x8xf32>
    %cst_60 = arith.constant dense<0.000000e+00> : vector<8x4xf32>
    %176 = tpu.matmul %175, %162, %cst_60 {dimension_numbers = #tpu.dot_dimension_numbers<[1], [0], [0], [1], [0, 0, 1, 1], [], []>} : vector<8x8xf32>, vector<8x4xf32>, vector<8x4xf32> -> vector<8x4xf32>
    %177 = vector.extract_strided_slice %18 {offsets = [28, 0], sizes = [4, 32], strides = [1, 1]} : vector<32x32xf32> to vector<4x32xf32>
    %cst_61 = arith.constant dense<0.000000e+00> : vector<8x32xf32>
    %178 = tpu.matmul %176, %177, %cst_61 {dimension_numbers = #tpu.dot_dimension_numbers<[1], [0], [0], [1], [0, 0, 1, 1], [], []>} : vector<8x4xf32>, vector<4x32xf32>, vector<8x32xf32> -> vector<8x32xf32>
    %179 = arith.addf %159, %178 : vector<8x32xf32>
    %c0_62 = arith.constant 0 : index
    %c0_63 = arith.constant 0 : index
    %180 = vector.load %arg6[%c0_62, %c0_63] : memref<1x32xf32, #tpu.memory_space<vmem>>, vector<1x32xf32>
    %181 = vector.broadcast %180 : vector<1x32xf32> to vector<8x32xf32>
    %182 = arith.addf %179, %181 : vector<8x32xf32>
    %183 = arith.addf %1, %182 : vector<8x32xf32>
    %cst_64 = arith.constant dense<0.000000e+00> : vector<8xf32>
    %184 = vector.multi_reduction <add>, %183, %cst_64 [1] : vector<8x32xf32> to vector<8xf32>
    %185 = vector.shape_cast %184 : vector<8xf32> to vector<8x1xf32>
    %cst_65 = arith.constant 3.200000e+01 : f32
    %186 = vector.broadcast %cst_65 : f32 to vector<8x1xf32>
    %187 = arith.divf %185, %186 : vector<8x1xf32>
    %188 = vector.broadcast %187 : vector<8x1xf32> to vector<8x32xf32>
    %189 = arith.subf %183, %188 : vector<8x32xf32>
    %190 = arith.mulf %189, %189 : vector<8x32xf32>
    %cst_66 = arith.constant dense<0.000000e+00> : vector<8xf32>
    %191 = vector.multi_reduction <add>, %190, %cst_66 [1] : vector<8x32xf32> to vector<8xf32>
    %192 = vector.shape_cast %191 : vector<8xf32> to vector<8x1xf32>
    %cst_67 = arith.constant 3.200000e+01 : f32
    %193 = vector.broadcast %cst_67 : f32 to vector<8x1xf32>
    %194 = arith.divf %192, %193 : vector<8x1xf32>
    %195 = vector.broadcast %187 : vector<8x1xf32> to vector<8x32xf32>
    %196 = arith.subf %183, %195 : vector<8x32xf32>
    %cst_68 = arith.constant 9.99999974E-6 : f32
    %197 = vector.broadcast %cst_68 : f32 to vector<8x1xf32>
    %198 = arith.addf %194, %197 : vector<8x1xf32>
    %199 = math.rsqrt %198 : vector<8x1xf32>
    %200 = vector.broadcast %199 : vector<8x1xf32> to vector<8x32xf32>
    %201 = arith.mulf %196, %200 : vector<8x32xf32>
    %c0_69 = arith.constant 0 : index
    %c0_70 = arith.constant 0 : index
    %202 = vector.load %arg7[%c0_69, %c0_70] : memref<1x32xf32, #tpu.memory_space<vmem>>, vector<1x32xf32>
    %203 = vector.broadcast %202 : vector<1x32xf32> to vector<8x32xf32>
    %204 = arith.mulf %201, %203 : vector<8x32xf32>
    %c0_71 = arith.constant 0 : index
    %c0_72 = arith.constant 0 : index
    %205 = vector.load %arg8[%c0_71, %c0_72] : memref<1x32xf32, #tpu.memory_space<vmem>>, vector<1x32xf32>
    %206 = vector.broadcast %205 : vector<1x32xf32> to vector<8x32xf32>
    %207 = arith.addf %204, %206 : vector<8x32xf32>
    %c0_73 = arith.constant 0 : index
    %c0_74 = arith.constant 0 : index
    %208 = vector.load %arg9[%c0_73, %c0_74] : memref<32x64xf32, #tpu.memory_space<vmem>>, vector<32x64xf32>
    %cst_75 = arith.constant dense<0.000000e+00> : vector<8x64xf32>
    %209 = tpu.matmul %207, %208, %cst_75 {dimension_numbers = #tpu.dot_dimension_numbers<[1], [0], [0], [1], [0, 0, 1, 1], [], []>} : vector<8x32xf32>, vector<32x64xf32>, vector<8x64xf32> -> vector<8x64xf32>
    %c0_76 = arith.constant 0 : index
    %c0_77 = arith.constant 0 : index
    %210 = vector.load %arg10[%c0_76, %c0_77] : memref<1x64xf32, #tpu.memory_space<vmem>>, vector<1x64xf32>
    %211 = vector.broadcast %210 : vector<1x64xf32> to vector<8x64xf32>
    %212 = arith.addf %209, %211 : vector<8x64xf32>
    %cst_78 = arith.constant 0.000000e+00 : f32
    %213 = vector.broadcast %cst_78 : f32 to vector<8x64xf32>
    %214 = arith.maximumf %212, %213 : vector<8x64xf32>
    %c0_79 = arith.constant 0 : index
    %c0_80 = arith.constant 0 : index
    %215 = vector.load %arg11[%c0_79, %c0_80] : memref<64x32xf32, #tpu.memory_space<vmem>>, vector<64x32xf32>
    %cst_81 = arith.constant dense<0.000000e+00> : vector<8x32xf32>
    %216 = tpu.matmul %214, %215, %cst_81 {dimension_numbers = #tpu.dot_dimension_numbers<[1], [0], [0], [1], [0, 0, 1, 1], [], []>} : vector<8x64xf32>, vector<64x32xf32>, vector<8x32xf32> -> vector<8x32xf32>
    %c0_82 = arith.constant 0 : index
    %c0_83 = arith.constant 0 : index
    %217 = vector.load %arg12[%c0_82, %c0_83] : memref<1x32xf32, #tpu.memory_space<vmem>>, vector<1x32xf32>
    %218 = vector.broadcast %217 : vector<1x32xf32> to vector<8x32xf32>
    %219 = arith.addf %216, %218 : vector<8x32xf32>
    %220 = arith.addf %207, %219 : vector<8x32xf32>
    %cst_84 = arith.constant dense<0.000000e+00> : vector<8xf32>
    %221 = vector.multi_reduction <add>, %220, %cst_84 [1] : vector<8x32xf32> to vector<8xf32>
    %222 = vector.shape_cast %221 : vector<8xf32> to vector<8x1xf32>
    %cst_85 = arith.constant 3.200000e+01 : f32
    %223 = vector.broadcast %cst_85 : f32 to vector<8x1xf32>
    %224 = arith.divf %222, %223 : vector<8x1xf32>
    %225 = vector.broadcast %224 : vector<8x1xf32> to vector<8x32xf32>
    %226 = arith.subf %220, %225 : vector<8x32xf32>
    %227 = arith.mulf %226, %226 : vector<8x32xf32>
    %cst_86 = arith.constant dense<0.000000e+00> : vector<8xf32>
    %228 = vector.multi_reduction <add>, %227, %cst_86 [1] : vector<8x32xf32> to vector<8xf32>
    %229 = vector.shape_cast %228 : vector<8xf32> to vector<8x1xf32>
    %cst_87 = arith.constant 3.200000e+01 : f32
    %230 = vector.broadcast %cst_87 : f32 to vector<8x1xf32>
    %231 = arith.divf %229, %230 : vector<8x1xf32>
    %232 = vector.broadcast %224 : vector<8x1xf32> to vector<8x32xf32>
    %233 = arith.subf %220, %232 : vector<8x32xf32>
    %cst_88 = arith.constant 9.99999974E-6 : f32
    %234 = vector.broadcast %cst_88 : f32 to vector<8x1xf32>
    %235 = arith.addf %231, %234 : vector<8x1xf32>
    %236 = math.rsqrt %235 : vector<8x1xf32>
    %237 = vector.broadcast %236 : vector<8x1xf32> to vector<8x32xf32>
    %238 = arith.mulf %233, %237 : vector<8x32xf32>
    %c0_89 = arith.constant 0 : index
    %c0_90 = arith.constant 0 : index
    %239 = vector.load %arg13[%c0_89, %c0_90] : memref<1x32xf32, #tpu.memory_space<vmem>>, vector<1x32xf32>
    %240 = vector.broadcast %239 : vector<1x32xf32> to vector<8x32xf32>
    %241 = arith.mulf %238, %240 : vector<8x32xf32>
    %c0_91 = arith.constant 0 : index
    %c0_92 = arith.constant 0 : index
    %242 = vector.load %arg14[%c0_91, %c0_92] : memref<1x32xf32, #tpu.memory_space<vmem>>, vector<1x32xf32>
    %243 = vector.broadcast %242 : vector<1x32xf32> to vector<8x32xf32>
    %244 = arith.addf %241, %243 : vector<8x32xf32>
    %c0_93 = arith.constant 0 : index
    %c0_94 = arith.constant 0 : index
    %c0_95 = arith.constant 0 : index
    %245 = vector.load %arg15[%c0_93, %c0_94, %c0_95] : memref<1x8x32xf32, #tpu.memory_space<vmem>>, vector<1x8x32xf32>
    %246 = vector.shape_cast %245 : vector<1x8x32xf32> to vector<8x32xf32>
    %247 = vector.shape_cast %244 : vector<8x32xf32> to vector<1x8x32xf32>
    tpu.vector_store %arg15[%c0_93, %c0_94, %c0_95], %247 {strides = array<i32>} : memref<1x8x32xf32, #tpu.memory_space<vmem>>, vector<1x8x32xf32>,
    return
  }
  func.func @transform_0(%arg0: i32) -> (i32, i32, i32) {
    %c0_i32 = arith.constant 0 : i32
    %c0_i32_0 = arith.constant 0 : i32
    %c0_i32_1 = arith.constant 0 : i32
    return %arg0, %c0_i32, %c0_i32_0 : i32, i32, i32
  }
  func.func @transform_1(%arg0: i32) -> (i32, i32, i32) {
    %c0_i32 = arith.constant 0 : i32
    %c0_i32_0 = arith.constant 0 : i32
    %c0_i32_1 = arith.constant 0 : i32
    return %arg0, %c0_i32, %c0_i32_0 : i32, i32, i32
  }
  func.func @transform_2(%arg0: i32) -> (i32, i32) {
    %c0_i32 = arith.constant 0 : i32
    %c0_i32_0 = arith.constant 0 : i32
    %c0_i32_1 = arith.constant 0 : i32
    return %c0_i32, %c0_i32_0 : i32, i32
  }
  func.func @transform_3(%arg0: i32) -> (i32, i32) {
    %c0_i32 = arith.constant 0 : i32
    %c0_i32_0 = arith.constant 0 : i32
    %c0_i32_1 = arith.constant 0 : i32
    return %c0_i32, %c0_i32_0 : i32, i32
  }
  func.func @transform_4(%arg0: i32) -> (i32, i32) {
    %c0_i32 = arith.constant 0 : i32
    %c0_i32_0 = arith.constant 0 : i32
    %c0_i32_1 = arith.constant 0 : i32
    return %c0_i32, %c0_i32_0 : i32, i32
  }
  func.func @transform_5(%arg0: i32) -> (i32, i32) {
    %c0_i32 = arith.constant 0 : i32
    %c0_i32_0 = arith.constant 0 : i32
    %c0_i32_1 = arith.constant 0 : i32
    return %c0_i32, %c0_i32_0 : i32, i32
  }
  func.func @transform_6(%arg0: i32) -> (i32, i32) {
    %c0_i32 = arith.constant 0 : i32
    %c0_i32_0 = arith.constant 0 : i32
    %c0_i32_1 = arith.constant 0 : i32
    return %c0_i32, %c0_i32_0 : i32, i32
  }
  func.func @transform_7(%arg0: i32) -> (i32, i32) {
    %c0_i32 = arith.constant 0 : i32
    %c0_i32_0 = arith.constant 0 : i32
    %c0_i32_1 = arith.constant 0 : i32
    return %c0_i32, %c0_i32_0 : i32, i32
  }
  func.func @transform_8(%arg0: i32) -> (i32, i32) {
    %c0_i32 = arith.constant 0 : i32
    %c0_i32_0 = arith.constant 0 : i32
    %c0_i32_1 = arith.constant 0 : i32
    return %c0_i32, %c0_i32_0 : i32, i32
  }
  func.func @transform_9(%arg0: i32) -> (i32, i32) {
    %c0_i32 = arith.constant 0 : i32
    %c0_i32_0 = arith.constant 0 : i32
    %c0_i32_1 = arith.constant 0 : i32
    return %c0_i32, %c0_i32_0 : i32, i32
  }
  func.func @transform_10(%arg0: i32) -> (i32, i32) {
    %c0_i32 = arith.constant 0 : i32
    %c0_i32_0 = arith.constant 0 : i32
    %c0_i32_1 = arith.constant 0 : i32
    return %c0_i32, %c0_i32_0 : i32, i32
  }
  func.func @transform_11(%arg0: i32) -> (i32, i32) {
    %c0_i32 = arith.constant 0 : i32
    %c0_i32_0 = arith.constant 0 : i32
    %c0_i32_1 = arith.constant 0 : i32
    return %c0_i32, %c0_i32_0 : i32, i32
  }
  func.func @transform_12(%arg0: i32) -> (i32, i32) {
    %c0_i32 = arith.constant 0 : i32
    %c0_i32_0 = arith.constant 0 : i32
    %c0_i32_1 = arith.constant 0 : i32
    return %c0_i32, %c0_i32_0 : i32, i32
  }
  func.func @transform_13(%arg0: i32) -> (i32, i32) {
    %c0_i32 = arith.constant 0 : i32
    %c0_i32_0 = arith.constant 0 : i32
    %c0_i32_1 = arith.constant 0 : i32
    return %c0_i32, %c0_i32_0 : i32, i32
  }
  func.func @transform_14(%arg0: i32) -> (i32, i32, i32) {
    %c0_i32 = arith.constant 0 : i32
    %c0_i32_0 = arith.constant 0 : i32
    %c0_i32_1 = arith.constant 0 : i32
    return %arg0, %c0_i32, %c0_i32_0 : i32, i32, i32
  }
}

</mosaic_0001>

<bundles_post_ra>
// kernel: tpu_custom_call.1
= control target key start
LH: loop header
LB: loop body
LE: loop exit
PB: predicated region body
PF: predicated region fallthrough
CT: control target
= control target key end

     0   :  { %s4035_s0 = inlined_call_operand.hbm [shape: f32[2,8,32], index: 0, kind: input, shape index: {}]   ;;  %s4036_s1 = inlined_call_operand.hbm [shape: f32[2,1,8], index: 1, kind: input, shape index: {}]   ;;  %s4037_s2 = inlined_call_operand.vmem [shape: f32[32,96], index: 2, kind: input, shape index: {}]   ;;  %s4038_s3 = inlined_call_operand.vmem [shape: f32[1,96], index: 3, kind: input, shape index: {}]   ;;  %s4039_s4 = inlined_call_operand.vmem [shape: f32[32,32], index: 4, kind: input, shape index: {}]   ;;  %s4040_s5 = inlined_call_operand.vmem [shape: f32[1,32], index: 5, kind: input, shape index: {}]   ;;  %s4041_s6 = inlined_call_operand.vmem [shape: f32[1,32], index: 6, kind: input, shape index: {}]   ;;  %s4042_s7 = inlined_call_operand.vmem [shape: f32[1,32], index: 7, kind: input, shape index: {}]   ;;  %s4043_s8 = inlined_call_operand.vmem [shape: f32[32,64], index: 8, kind: input, shape index: {}]   ;;  %s4044_s9 = inlined_call_operand.vmem [shape: f32[1,64], index: 9, kind: input, shape index: {}]   ;;  %s4045_s10 = inlined_call_operand.vmem [shape: f32[64,32], index: 10, kind: input, shape index: {}]   ;;  %s4046_s11 = inlined_call_operand.vmem [shape: f32[1,32], index: 11, kind: input, shape index: {}]   ;;  %s4047_s12 = inlined_call_operand.vmem [shape: f32[1,32], index: 12, kind: input, shape index: {}]   ;;  %s4048_s13 = inlined_call_operand.vmem [shape: f32[1,32], index: 13, kind: input, shape index: {}]   ;;  %s4049_s14 = inlined_call_operand.hbm [shape: f32[2,8,32], index: 14, kind: output, shape index: {}]  }
   0x1   :  { %4058 = sst [smem:[#allocation16_spill]] %s4035_s0 }
   0x2   :  { %4059 = sst [smem:[#allocation17_spill]] %s4048_s13 }
   0x3   :  { %4060 = sst [smem:[#allocation18_spill]] %s4049_s14 }
   0x4   :  { %19 = vsyncpa [#allocation3], 0 }
   0x5   :  { %21 = vsyncpa [#allocation3 + $0x1], 0 }
   0x6   :  { %22 = vsyncpa [#allocation6], 0 }
   0x7   :  { %24 = vsyncpa [#allocation6 + $0x1], 0 }
   0x8   :  { %25 = vsyncpa [#allocation4], 0 }
   0x9   :  { %27 = vsyncpa [#allocation4 + $0x1], 0  ;;  %s3544_s29 = smov 0   ;;  %s3546_s30 = smov 0  }
   0xa   :  { %s3548_s15 = smov 0   ;;  %s3550_s16 = smov 0  }
   0xb LB: > { %4061 = sst [smem:[#allocation11_spill]] %s3426_s29  ;;  %s3565_s17 = sadd.s32 4294967295, %s3438_s16   ;;  %s3438_s16 = sphi %s3550_s16, %s4084_s16   ;;  %s3434_s15 = sphi %s3548_s15, %s4086_s15   ;;  %s3430_s30 = sphi %s3546_s30, %s4088_s30   ;;  %s3426_s29 = sphi %s3544_s29, %s4087_s29  }
   0xc   : > { %4062 = sst [smem:[#allocation12_spill]] %s3434_s15  ;;  %s2909_s18 = sadd.s32 4294967294, %s3438_s16  }
   0xd   : > { %s3569_s19 = sadd.s32 1, %s3438_s16   ;;  %s40_s20 = sadd.s32 1, %s3434_s15 }
   0xe   : > { %4063 = sst [smem:[#allocation13_spill]] %s3569_s19  ;;  %s37_s21 = ssub.s32 %s3438_s16, %s3569_s19 }
   0xf   : > { %p47_p0 = scmp.ne.s32.totalorder %s3434_s15, %s3430_s30  ;;  %p38_p1 = scmp.eq.s32.totalorder %s37_s21, 0 }
  0x10   : > { %p48_p2 = scmp.eq.s32.totalorder %s3438_s16, 0  ;;  %p53_p3 = scmp.ne.s32.totalorder %s3430_s30, %s3426_s29 }
  0x11   : > { %p54_p4 = scmp.eq.s32.totalorder %s3565_s17, 0  ;;  %p355_p7 = scmp.eq.s32.totalorder %s3565_s17, 1 }
  0x12   : > { %s3581_s22 = scalar_select %p38_p1, %s3434_s15, %s40_s20  }
  0x13   : > { %p3583_p5 = por %p48_p2, %p47_p0  ;;  %p3587_p6 = por %p54_p4, %p53_p3 }
  0x14   : > { %4064 = sst [smem:[#allocation14_spill]] %s3581_s22  ;;  %p361_p8 = scmp.eq.s32.totalorder %s2909_s18, 1 }
  0x15   : > { %s4066_s24 = scalar_select %p3587_p6, 1, 0 }
  0x16   : > { %p3218_p10 = scmp.lt.s32.totalorder %s3438_s16, 2  ;;  %p3594_p11 = por %p355_p7, %p47_p0 }
  0x17   : > { %p3598_p12 = por %p361_p8, %p53_p3  ;;  %s3603_s27 = sand.u32 1, %s3434_s15  }
  0x18   : > { %s4067_s25 = scalar_select %p3594_p11, 1, 0 }
  0x19   : > { %s4068_s26 = scalar_select %p3598_p12, 1, 0 }
  0x1a   : > { %s2913_s28 = sshll.u32 %s3438_s16, 7  ;;  %s2912_s20 = sshll.u32 %s3603_s27, 3 }
  0x1b   : > { %4069 = sst [smem:[#allocation15_spill]] %s4068_s26  ;;  %s421_s19 = scalar_lea.vmem [#allocation2], %s2912_s20 }
  0x1c   : > { %s4070_s0 = sld [smem:[#allocation16_spill]]  ;;  %s428_s29 = sshll.u32 %s421_s19, 4  ;;  %s3618_s29 = int_to_ptr.vmem [resolvable:$true] %s428_s29 }
  0x1d   : > { %p3614_p13 = pnand %p3218_p10, %p3583_p5  ;;  %s418_s15 = scalar_lea.sflag [#allocation3], %s3603_s27 }
  0x1f   : > { %p3316_p3 = pneg %p3614_p13 }
  0x22   : > { %s3610_s18 = scalar_lea.hbm %s4070_s0, %s2913_s28  ;;  %s3319_s28 = scalar_lea.hbm %s4070_s0, 256 }
  0x23   : > { %s3314_s22 = scalar_lea.hbm %s3610_s18, 128  ;;  %p3320_p5 = scmp.lt.s32.totalorder %s3610_s18, %s4070_s0 }
  0x24   : > { %p3315_p2 = scmp.ne.s32.totalorder %s3610_s18, %s3314_s22  ;;  %p3321_p8 = scmp.lt.s32.totalorder %s3319_s28, %s3314_s22 }
  0x26   : > { %p3317_p4 = pnand %p3316_p3, %p3315_p2  ;;  %p3322_p10 = por %p3321_p8, %p3320_p5 }
  0x28   : > { %p3318_p7 = pneg %p3317_p4 }
  0x2a   : > { %p3323_p9 = pnand %p3322_p10, %p3318_p7 }
  0x2c   : > { %3326 = shalt.err (!%p3323_p9)
}
  0x2d   : > { %s3327_s26 = scalar_lea.vmem %s3618_s29, 128  ;;  %s3440_s19 = smov [#allocation2]  }
  0x2e   : > { %p3328_p0 = scmp.ne.s32.totalorder %s3618_s29, %s3327_s26  ;;  %s3332_s23 = sshll.u32 %s3440_s19, 4  ;;  %s3333_s23 = int_to_ptr.vmem [resolvable:$false] %s3332_s23 }
  0x2f   : > { %s3334_s13 = scalar_lea.vmem %s3333_s23, 256  ;;  %p3335_p1 = scmp.lt.s32.totalorder %s3618_s29, %s3333_s23 }
  0x30   : > { %p3330_p2 = pnand %p3328_p0, %p3316_p3  ;;  %p3336_p12 = scmp.lt.s32.totalorder %s3334_s13, %s3327_s26 }
  0x32   : > { %p3331_p4 = pneg %p3330_p2  ;;  %p3337_p11 = por %p3336_p12, %p3335_p1 }
  0x34   : > { %p3338_p5 = pnand %p3337_p11, %p3331_p4 }
  0x36   : > { %3341 = shalt.err (!%p3338_p5)
}
  0x37   : > { %3210 = dma.hbm_to_vmem [thread:$0]  (!%p3614_p13), %s3610_s18, 128, %s3618_s29, %s418_s15  }
  0x38   : > { %p4072_p9 = scmp.lt.s32.totalorder %s3438_s16, 3  ;;  %p4073_p0 = scmp.ge.s32.totalorder %s3438_s16, 1 }
  0x39   : > { %s2914_s13 = sshll.u32 %s3438_s16, 4  ;;  %s438_s21 = scalar_lea.vmem [#allocation5], %s3603_s27 }
  0x3a   : > { %p3651_p7 = pnand %p4073_p0, %p4072_p9  ;;  %s3659_s20 = scalar_lea.hbm %s4036_s1, %s2914_s13 }
  0x3b   : > { %s445_s19 = sshll.u32 %s438_s21, 4  ;;  %s436_s23 = scalar_lea.sflag [#allocation6], %s3603_s27  ;;  %s446_s19 = int_to_ptr.vmem [resolvable:$true] %s445_s19 }
  0x3c   : > { %s4074_s22 = scalar_select %p3651_p7, 1, 0 }
  0x3d   : > { %s3342_s29 = scalar_lea.hbm %s3659_s20, 16  ;;  %s3347_s0 = scalar_lea.hbm %s4036_s1, 32 }
  0x3e   : > { %p3343_p11 = scmp.ne.s32.totalorder %s3659_s20, %s3342_s29  ;;  %p3348_p8 = scmp.lt.s32.totalorder %s3659_s20, %s4036_s1 }
  0x3f   : > { %p3349_p10 = scmp.lt.s32.totalorder %s3347_s0, %s3342_s29 }
  0x40   : > { %p3345_p12 = pnand %p3343_p11, %p3316_p3 }
  0x41   : > { %p3350_p2 = por %p3349_p10, %p3348_p8 }
  0x42   : > { %p3346_p1 = pneg %p3345_p12 }
  0x44   : > { %p3351_p4 = pnand %p3350_p2, %p3346_p1 }
  0x46   : > { %3354 = shalt.err (!%p3351_p4)
}
  0x47   : > { %s3355_s28 = scalar_lea.vmem %s446_s19, 16  ;;  %s3441_s27 = smov [#allocation5]  }
  0x48   : > { %p3356_p5 = scmp.ne.s32.totalorder %s446_s19, %s3355_s28  ;;  %s3360_s21 = sshll.u32 %s3441_s27, 4  ;;  %s3361_s21 = int_to_ptr.vmem [resolvable:$false] %s3360_s21 }
  0x49   : > { %s3362_s15 = scalar_lea.vmem %s3361_s21, 32  ;;  %p3363_p11 = scmp.lt.s32.totalorder %s446_s19, %s3361_s21 }
  0x4a   : > { %p3358_p9 = pnand %p3356_p5, %p3316_p3  ;;  %p3364_p12 = scmp.lt.s32.totalorder %s3362_s15, %s3355_s28 }
  0x4c   : > { %p3359_p0 = pneg %p3358_p9  ;;  %p3365_p6 = por %p3364_p12, %p3363_p11 }
  0x4e   : > { %p3366_p7 = pnand %p3365_p6, %p3359_p0 }
  0x50   : > { %3369 = shalt.err (!%p3366_p7)
}
  0x51   : > { %3213 = dma.hbm_to_vmem [thread:$0]  (!%p3614_p13), %s3659_s20, 16, %s446_s19, %s436_s23  }
  0x52   : > { %p4075_p1 = scmp.ne.s32.totalorder %s4074_s22, 0 }
  0x53   : > { %s3684_s0 = sand.u32 (!%p4075_p1), 1, %s3430_s30   ;;  %p4076_p6 = scmp.ne.s32.totalorder (!%p4075_p1), %s4066_s24, 0 }
  0x54   : > { %454 = sbr.rel (%p4075_p1) target bundleno = 5593 (0x15d9), region = 76  ;;  %s2916_s29 = sshll.u32 (!%p4075_p1), %s3684_s0, 3 }
  0x55   : > { %s457_s18 = scalar_lea.sflag (!%p4075_p1), [#allocation3], %s3684_s0  ;;  %s460_s26 = scalar_lea.vmem (!%p4075_p1), [#allocation2], %s2916_s29 }
  0x59   : > { %3413 = dma.done.wait (%p4076_p6), %s457_s18, 128  }
  0x5a   : > { %3415 = vsyncadd (%p4076_p6), %s457_s18, 4294967168  ;;  %s466_s14 = scalar_lea.sflag [#allocation6], %s3684_s0  ;;  %s468_s22 = scalar_lea.vmem [#allocation5], %s3684_s0 }
  0x5b   : > { %3417 = dma.done.wait (%p4076_p6), %s466_s14, 16  }
  0x5c   : > { %3419 = vsyncadd (%p4076_p6), %s466_s14, 4294967280  ;;  %v3442_v0 = vmov 0.0   ;;  %vm3443_vm0 = vmmov 0   ;;  %v522_v1 = vld [vmem:[%s4037_s2 + $0x18] sm:$0xff]  ;;  %v521_v2 = vld [vmem:[%s4037_s2 + $0x10] sm:$0xff]  ;;  %vm530_vm1 = vcmask 261120   ;;  %v607_v14 = vlaneseq }
  0x5d   : > { %3040 = vmatprep.subr.mxu0 %v3442_v0  ;;  %3048 = vmatprep.mubr.msk.f32.mxu0 %vm3443_vm0, %v3442_v0  ;;  %v520_v3 = vld [vmem:[%s4037_s2 + $0x8] sm:$0xff]  ;;  %v519_v4 = vld [vmem:[%s4037_s2] sm:$0xff]  ;;  %s3445_s14 = smov 124   ;;  %s3446_s20 = smov 92   ;;  %vm619_vm2 = vcmask 31744   ;;  %v3447_v18 = vmov 0  }
  0x5e   : > { %3056 = vmatprep.subr.mxu1 %v3442_v0  ;;  %3058 = vmatprep.mubr.msk.f32.mxu1 %vm3443_vm0, %v3442_v0  ;;  %v3720_v5 = vld [vmem:[%s460_s26] sm:$0xff]  ;;  %s3444_s26 = smov 96   ;;  %v608_v16 = vshrl.u32 %v607_v14, 7  ;;  %vm696_vm5 = vcmask 64512   ;;  %s3449_s19 = smov 64   ;;  %vm955_vm6 = vcmask 1043456  }
  0x5f   : > { %3041 = vmatpush3.msra.mxu0 %v522_v1  ;;  %v2918_v6 = vld [vmem:[%s4038_s3] ss:$0 sm:$0xff]  ;;  %s3450_s23 = smov 88   ;;  %s3451_s13 = smov 120   ;;  %vm2700_vm7 = vcmask 523264  }
  0x60   : > { %3042 = vmatprep.subr.mxu0 %v3442_v0  ;;  %v518_v15 = vld [vmem:[%s468_s22] sm:$0x1]  ;;  %v609_v17 = vsub.s32 0, %v608_v16  ;;  %s3448_s22 = smov 60   ;;  %s3452_s27 = smov 84  }
  0x61   : > { %3043 = vmatpush3.msra.mxu0 %v521_v2  ;;  %vm605_vm3 = vcmp.gt.f32.partialorder %v518_v15, 0.5  ;;  %v612_v47 = vld [vmem:[%s4039_s4] sm:$0xff]  ;;  %s3453_s21 = smov 116   ;;  %s3454_s15 = smov 56   ;;  %v613_v15 = vld [vmem:[%s4039_s4 + $0x8] sm:$0xff] }
  0x62   : > { %3044 = vmatprep.subr.mxu0 %v3442_v0  ;;  %v606_v19 = vsel %vm605_vm3, 1, %v3447_v18  ;;  %v951_v48 = vrot.slane %v612_v47, 4  ;;  %v1512_v16 = vrot.slane %v613_v15, 4  ;;  %s3464_s18 = smov 68   ;;  %p4079_p3 = scmp.ne.s32.totalorder %s4067_s25, 0 }
  0x63   : > { %3045 = vmatpush3.msra.mxu0 %v520_v3  ;;  %v3752_v20 = vrot.slane %v606_v19, %v609_v17 }
  0x64   : > { %3046 = vmatprep.subr.mxu0 %v3442_v0 }
  0x65   : > { %3047 = vmatpush3.msra.mxu0 %v519_v4  ;;  %vm611_vm4 = vcmp.eq.s32.totalorder %v3752_v20, 1 }
  0x66   : > { %3049 = vmatmul.mubr.msk.f32.vlgmr.msra.gmra.mxu0 %vm530_vm1, %v3720_v5  ;;  %3051 = vmatprep.subr.mxu0 %v3442_v0 }
  0x67   : > { %3053 = vmatprep.mubr.msk.f32.mxu0 %vm3443_vm0, %v3442_v0 }
 0x126   : > { %v600_v7 = vpop.f32.mrf.mxu0 }
 0x127   : > { %v3731_v8 = vadd.f32 %v2918_v6, %v600_v7 }
 0x128   : > { %v3050_v9 = vpop.f32.mrf.mxu0 }
 0x129   : > { %617 = vrot.lane.b32.xlu0 %v3731_v8, %s3444_s26  ;;  %v3735_v10 = vmul.f32 0.5, %v3731_v8  ;;  %s3465_s26 = smov 100  }
 0x12b   : > { %784 = vrot.lane.b32.xlu1 %v3735_v10, %s3445_s14  ;;  %s3455_s14 = smov 52  }
 0x12d   : > { %786 = vrot.lane.b32.xlu0 %v3731_v8, %s3446_s20  ;;  %s3456_s20 = smov 112  }
 0x19b   : > { %v618_v11 = vpop.permute.xlu0 %617 }
 0x19c   : > { %3052 = vmatpush3.xpose.msk.msra.mxu0 %vm619_vm2, %v618_v11 }
 0x19d   : > { %3061 = vmatprep.subr.mxu0 %v3442_v0  ;;  %v785_v13 = vpop.permute.xlu1 %784 }
 0x19f   : > { %v787_v12 = vpop.permute.xlu0 %786  ;;  %3054 = vmatmul.mubr.msk.f32.vlgmr.msra.gmra.mxu0 %vm619_vm2, %v3735_v10 }
 0x1a0   : > { %3062 = vmatpush3.xpose.msk.msra.mxu0 %vm619_vm2, %v787_v12  ;;  %3063 = vmatprep.mubr.msk.f32.mxu0 %vm3443_vm0, %v3442_v0 }
 0x1a1   : > { %3071 = vmatprep.subr.mxu0 %v3442_v0 }
 0x1a3   : > { %3064 = vmatmul.mubr.msk.f32.vlgmr.msra.gmra.mxu0 %vm619_vm2, %v785_v13 }
 0x1a4   : > { %3073 = vmatprep.mubr.msk.f32.mxu0 %vm3443_vm0, %v3442_v0  ;;  %3072 = vmatpush3.msk.msra.mxu0 %vm955_vm6, %v951_v48 }
 0x1a5   : > { %3081 = vmatprep.subr.mxu0 %v3442_v0 }
 0x25f   : > { %v691_v21 = vpop.f32.mrf.mxu0 }
 0x260   : > { %v695_v22 = vsel %vm611_vm4, -65504.0, %v691_v21 }
 0x261   : > { %v3055_v23 = vpop.f32.mrf.mxu0  ;;  %v697_v24 = vsel %vm696_vm5, %v695_v22, -inf }
 0x262   : > { %698 = vmax.xlane.f32.xlu1 %v697_v24 }
 0x263   : > { %v858_v25 = vpop.f32.mrf.mxu0 }
 0x264   : > { %v862_v26 = vsel %vm611_vm4, -65504.0, %v858_v25 }
 0x265   : > { %v3065_v27 = vpop.f32.mrf.mxu0  ;;  %v863_v28 = vsel %vm696_vm5, %v862_v26, -inf }
 0x266   : > { %864 = vmax.xlane.f32.xlu0 %v863_v28 }
 0x2eb   : > { %v699_v29 = vpop.xlane.xlu1 %698 }
 0x2ec   : > { %v700_v30 = vsub.f32 %v695_v22, %v699_v29 }
 0x2ee   : > { %v701_v31 = vmul.f32 1.442695, %v700_v30 }
 0x2ef   : > { %v865_v32 = vpop.xlane.xlu0 %864 }
 0x2f0   : > { %3278 = vpow2.f32 %v701_v31  ;;  %v866_v33 = vsub.f32 %v862_v26, %v865_v32 }
 0x2f2   : > { %v867_v34 = vmul.f32 1.442695, %v866_v33 }
 0x2f4   : > { %3280 = vpow2.f32 %v867_v34 }
 0x2fd   : > { %v3279_v35 = vpop.eup %3278 }
 0x2fe   : > { %v703_v36 = vsel %vm696_vm5, %v3279_v35, 0.0 }
 0x2ff   : > { %704 = vadd.xlane.f32.xlu0 %v703_v36 }
 0x301   : > { %v3281_v37 = vpop.eup %3280 }
 0x302   : > { %v869_v38 = vsel %vm696_vm5, %v3281_v37, 0.0 }
 0x303   : > { %870 = vadd.xlane.f32.xlu1 %v869_v38 }
 0x314   : > { %874 = vrot.lane.b32.xlu1 %v3731_v8, %s3448_s22  ;;  %s3457_s22 = smov 80  }
 0x315   : > { %708 = vrot.lane.b32.xlu0 %v3731_v8, %s3449_s19  ;;  %s3458_s19 = smov 76  }
 0x318   : > { %1105 = vrot.lane.b32.xlu1 %v3731_v8, %s3450_s23  ;;  %s3459_s23 = smov 108  }
 0x319   : > { %1103 = vrot.lane.b32.xlu0 %v3735_v10, %s3451_s13  ;;  %s3460_s13 = smov 48  }
 0x388   : > { %v705_v39 = vpop.xlane.xlu0 %704 }
 0x389   : > { %3282 = vrcp.f32 %v705_v39 }
 0x38c   : > { %v871_v40 = vpop.xlane.xlu1 %870  ;;  %v709_v41 = vpop.permute.xlu0 %708 }
 0x38d   : > { %3284 = vrcp.f32 %v871_v40  ;;  %3057 = vmatpush3.msra.mxu1 %v709_v41 }
 0x38e   : > { %3066 = vmatprep.subr.mxu1 %v3442_v0 }
 0x390   : > { %v875_v44 = vpop.permute.xlu1 %874  ;;  %v1104_v54 = vpop.permute.xlu0 %1103 }
 0x394   : > { %v1106_v52 = vpop.permute.xlu1 %1105 }
 0x396   : > { %v3283_v42 = vpop.eup %3282 }
 0x397   : > { %v707_v43 = vmul.f32 %v3283_v42, %v3279_v35 }
 0x399   : > { %3059 = vmatmul.mubr.msk.f32.vlgmr.msra.gmra.mxu1 %vm696_vm5, %v707_v43 }
 0x39a   : > { %v3285_v45 = vpop.eup %3284  ;;  %3067 = vmatpush3.msra.mxu1 %v875_v44  ;;  %3068 = vmatprep.mubr.msk.f32.mxu1 %vm3443_vm0, %v3442_v0 }
 0x39b   : > { %v873_v46 = vmul.f32 %v3285_v45, %v3281_v37  ;;  %3076 = vmatprep.subr.mxu1 %v3442_v0 }
 0x39d   : > { %3069 = vmatmul.mubr.msk.f32.vlgmr.msra.gmra.mxu1 %vm696_vm5, %v873_v46 }
 0x39e   : > { %3078 = vmatprep.mubr.msk.f32.mxu1 %vm3443_vm0, %v3442_v0  ;;  %3077 = vmatpush3.msk.msra.mxu1 %vm955_vm6, %v612_v47 }
 0x39f   : > { %3086 = vmatprep.subr.mxu1 %v3442_v0 }
 0x459   : > { %v780_v49 = vpop.f32.mrf.mxu1 }
 0x45a   : > { %3079 = vmatmul.mubr.msk.f32.vlgmr.msra.gmra.mxu1 %vm619_vm2, %v780_v49 }
 0x45b   : > { %v3060_v50 = vpop.f32.mrf.mxu1  ;;  %3088 = vmatprep.mubr.msk.f32.mxu1 %vm3443_vm0, %v3442_v0 }
 0x45d   : > { %v946_v51 = vpop.f32.mrf.mxu1 }
 0x45e   : > { %3074 = vmatmul.mubr.msk.f32.vlgmr.msra.gmra.mxu0 %vm619_vm2, %v946_v51 }
 0x45f   : > { %3082 = vmatpush3.xpose.msk.msra.mxu0 %vm619_vm2, %v1106_v52  ;;  %v3070_v53 = vpop.f32.mrf.mxu1  ;;  %3083 = vmatprep.mubr.msk.f32.mxu0 %vm3443_vm0, %v3442_v0 }
 0x460   : > { %3091 = vmatprep.subr.mxu0 %v3442_v0 }
 0x462   : > { %3084 = vmatmul.mubr.msk.f32.vlgmr.msra.gmra.mxu0 %vm619_vm2, %v1104_v54 }
 0x463   : > { %3093 = vmatprep.mubr.msk.f32.mxu0 %vm3443_vm0, %v3442_v0  ;;  %3092 = vmatpush3.msk.msra.mxu0 %vm955_vm6, %v613_v15 }
 0x464   : > { %3101 = vmatprep.subr.mxu0 %v3442_v0 }
 0x51a   : > { %v1099_v55 = vpop.f32.mrf.mxu1 }
 0x51c   : > { %v3080_v56 = vpop.f32.mrf.mxu1 }
 0x51e   : > { %v1024_v57 = vpop.f32.mrf.mxu0 }
 0x51f   : > { %v3793_v58 = vadd.f32 %v1099_v55, %v1024_v57 }
 0x520   : > { %v3075_v59 = vpop.f32.mrf.mxu0 }
 0x522   : > { %v1177_v60 = vpop.f32.mrf.mxu0 }
 0x523   : > { %v1181_v61 = vsel %vm611_vm4, -65504.0, %v1177_v60 }
 0x524   : > { %v3085_v62 = vpop.f32.mrf.mxu0  ;;  %v1182_v63 = vsel %vm696_vm5, %v1181_v61, -inf }
 0x525   : > { %1183 = vmax.xlane.f32.xlu1 %v1182_v63 }
 0x536   : > { %1348 = vrot.lane.b32.xlu1 %v3731_v8, %s3452_s27  ;;  %s3461_s27 = smov 44  }
 0x53a   : > { %1346 = vrot.lane.b32.xlu1 %v3735_v10, %s3453_s21  ;;  %s3462_s21 = smov 104  }
 0x5ae   : > { %v1184_v1 = vpop.xlane.xlu1 %1183 }
 0x5af   : > { %v1185_v2 = vsub.f32 %v1181_v61, %v1184_v1 }
 0x5b1   : > { %v1186_v3 = vmul.f32 1.442695, %v1185_v2 }
 0x5b2   : > { %v1349_v12 = vpop.permute.xlu1 %1348 }
 0x5b3   : > { %3286 = vpow2.f32 %v1186_v3 }
 0x5b6   : > { %v1347_v14 = vpop.permute.xlu1 %1346 }
 0x5c0   : > { %v3287_v4 = vpop.eup %3286 }
 0x5c1   : > { %v1188_v6 = vsel %vm696_vm5, %v3287_v4, 0.0 }
 0x5c2   : > { %1189 = vadd.xlane.f32.xlu0 %v1188_v6 }
 0x5d8   : > { %1193 = vrot.lane.b32.xlu0 %v3731_v8, %s3454_s15  ;;  %s3463_s15 = smov 72  }
 0x64b   : > { %v1190_v7 = vpop.xlane.xlu0 %1189 }
 0x64c   : > { %3288 = vrcp.f32 %v1190_v7 }
 0x64f   : > { %v1194_v9 = vpop.permute.xlu0 %1193 }
 0x650   : > { %3087 = vmatpush3.msra.mxu1 %v1194_v9 }
 0x651   : > { %3096 = vmatprep.subr.mxu1 %v3442_v0 }
 0x659   : > { %v3289_v11 = vpop.eup %3288 }
 0x65a   : > { %v1192_v13 = vmul.f32 %v3289_v11, %v3287_v4 }
 0x65c   : > { %3089 = vmatmul.mubr.msk.f32.vlgmr.msra.gmra.mxu1 %vm696_vm5, %v1192_v13 }
 0x65d   : > { %3097 = vmatpush3.xpose.msk.msra.mxu1 %vm619_vm2, %v1349_v12  ;;  %3098 = vmatprep.mubr.msk.f32.mxu1 %vm3443_vm0, %v3442_v0 }
 0x65e   : > { %3106 = vmatprep.subr.mxu1 %v3442_v0 }
 0x660   : > { %3099 = vmatmul.mubr.msk.f32.vlgmr.msra.gmra.mxu1 %vm619_vm2, %v1347_v14 }
 0x661   : > { %3108 = vmatprep.mubr.msk.f32.mxu1 %vm3443_vm0, %v3442_v0  ;;  %3107 = vmatpush3.msk.msra.mxu1 %vm955_vm6, %v1512_v16 }
 0x662   : > { %3116 = vmatprep.subr.mxu1 %v3442_v0 }
 0x71c   : > { %v1265_v17 = vpop.f32.mrf.mxu1 }
 0x71d   : > { %3094 = vmatmul.mubr.msk.f32.vlgmr.msra.gmra.mxu0 %vm619_vm2, %v1265_v17 }
 0x71e   : > { %v3090_v18 = vpop.f32.mrf.mxu1  ;;  %3103 = vmatprep.mubr.msk.f32.mxu0 %vm3443_vm0, %v3442_v0 }
 0x720   : > { %v1420_v19 = vpop.f32.mrf.mxu1 }
 0x721   : > { %v1424_v21 = vsel %vm611_vm4, -65504.0, %v1420_v19 }
 0x722   : > { %v3100_v22 = vpop.f32.mrf.mxu1  ;;  %v1425_v23 = vsel %vm696_vm5, %v1424_v21, -inf }
 0x723   : > { %1426 = vmax.xlane.f32.xlu0 %v1425_v23 }
 0x739   : > { %1436 = vrot.lane.b32.xlu0 %v3731_v8, %s3455_s14  ;;  %s3466_s14 = smov 40  }
 0x73d   : > { %1589 = vrot.lane.b32.xlu0 %v3735_v10, %s3456_s20 }
 0x7ac   : > { %v1427_v24 = vpop.xlane.xlu0 %1426 }
 0x7ad   : > { %v1428_v25 = vsub.f32 %v1424_v21, %v1427_v24 }
 0x7af   : > { %v1429_v26 = vmul.f32 1.442695, %v1428_v25 }
 0x7b0   : > { %v1437_v27 = vpop.permute.xlu0 %1436 }
 0x7b1   : > { %3290 = vpow2.f32 %v1429_v26  ;;  %3102 = vmatpush3.msra.mxu0 %v1437_v27 }
 0x7b2   : > { %3111 = vmatprep.subr.mxu0 %v3442_v0 }
 0x7b4   : > { %v1590_v37 = vpop.permute.xlu0 %1589 }
 0x7be   : > { %v3291_v28 = vpop.eup %3290 }
 0x7bf   : > { %v1431_v29 = vsel %vm696_vm5, %v3291_v28, 0.0 }
 0x7c0   : > { %1432 = vadd.xlane.f32.xlu1 %v1431_v29 }
 0x7d1   : > { %1591 = vrot.lane.b32.xlu1 %v3731_v8, %s3457_s22 }
 0x7dd   : > { %v1341_v30 = vpop.f32.mrf.mxu0 }
 0x7de   : > { %v1345_v31 = vadd.f32 %v1341_v30, %v3793_v58  ;;  %v614_v58 = vld [vmem:[%s4039_s4 + $0x10] sm:$0xff] }
 0x7df   : > { %v3095_v32 = vpop.f32.mrf.mxu0  ;;  %v1998_v59 = vrot.slane %v614_v58, 4 }
 0x849   : > { %v1433_v33 = vpop.xlane.xlu1 %1432 }
 0x84a   : > { %3292 = vrcp.f32 %v1433_v33 }
 0x84d   : > { %v1592_v36 = vpop.permute.xlu1 %1591 }
 0x857   : > { %v3293_v34 = vpop.eup %3292 }
 0x858   : > { %v1435_v35 = vmul.f32 %v3293_v34, %v3291_v28 }
 0x85a   : > { %3104 = vmatmul.mubr.msk.f32.vlgmr.msra.gmra.mxu0 %vm696_vm5, %v1435_v35 }
 0x85b   : > { %3112 = vmatpush3.xpose.msk.msra.mxu0 %vm619_vm2, %v1592_v36  ;;  %3113 = vmatprep.mubr.msk.f32.mxu0 %vm3443_vm0, %v3442_v0 }
 0x85c   : > { %3121 = vmatprep.subr.mxu0 %v3442_v0 }
 0x85e   : > { %3114 = vmatmul.mubr.msk.f32.vlgmr.msra.gmra.mxu0 %vm619_vm2, %v1590_v37 }
 0x85f   : > { %3123 = vmatprep.mubr.msk.f32.mxu0 %vm3443_vm0, %v3442_v0  ;;  %3122 = vmatpush3.msk.msra.mxu0 %vm955_vm6, %v614_v58 }
 0x860   : > { %3131 = vmatprep.subr.mxu0 %v3442_v0 }
 0x91a   : > { %v1508_v38 = vpop.f32.mrf.mxu0 }
 0x91b   : > { %3109 = vmatmul.mubr.msk.f32.vlgmr.msra.gmra.mxu1 %vm619_vm2, %v1508_v38 }
 0x91c   : > { %v3105_v39 = vpop.f32.mrf.mxu0  ;;  %3118 = vmatprep.mubr.msk.f32.mxu1 %vm3443_vm0, %v3442_v0 }
 0x91e   : > { %v1663_v40 = vpop.f32.mrf.mxu0 }
 0x91f   : > { %v1667_v41 = vsel %vm611_vm4, -65504.0, %v1663_v40  ;;  %v615_v40 = vld [vmem:[%s4039_s4 + $0x18] sm:$0xff] }
 0x920   : > { %v3115_v42 = vpop.f32.mrf.mxu0  ;;  %v1668_v43 = vsel %vm696_vm5, %v1667_v41, -inf }
 0x921   : > { %1669 = vmax.xlane.f32.xlu1 %v1668_v43 }
 0x932   : > { %1834 = vrot.lane.b32.xlu1 %v3731_v8, %s3458_s19  ;;  %s3467_s19 = smov 36  }
 0x936   : > { %1832 = vrot.lane.b32.xlu1 %v3735_v10, %s3459_s23  ;;  %s2970_s23 = sshll.u32 %s3565_s17, 7 }
 0x9aa   : > { %v1670_v44 = vpop.xlane.xlu1 %1669 }
 0x9ab   : > { %v1671_v45 = vsub.f32 %v1667_v41, %v1670_v44  ;;  %v2484_v41 = vrot.slane %v615_v40, 4 }
 0x9ad   : > { %v1672_v46 = vmul.f32 1.442695, %v1671_v45 }
 0x9ae   : > { %v1835_v55 = vpop.permute.xlu1 %1834 }
 0x9af   : > { %3294 = vpow2.f32 %v1672_v46 }
 0x9b2   : > { %v1833_v57 = vpop.permute.xlu1 %1832 }
 0x9bc   : > { %v3295_v47 = vpop.eup %3294 }
 0x9bd   : > { %v1674_v48 = vsel %vm696_vm5, %v3295_v47, 0.0 }
 0x9be   : > { %1675 = vadd.xlane.f32.xlu0 %v1674_v48 }
 0x9d4   : > { %1679 = vrot.lane.b32.xlu0 %v3731_v8, %s3460_s13  ;;  %s516_s13 = scalar_lea.vmem [#allocation7], %s2916_s29 }
 0x9d5   : > { %s2819_s24 = sshll.u32 %s516_s13, 4  ;;  %s2820_s24 = int_to_ptr.vmem [resolvable:$true] %s2819_s24 }
 0x9db   : > { %v1584_v49 = vpop.f32.mrf.mxu1 }
 0x9dc   : > { %v1588_v50 = vadd.f32 %v1584_v49, %v1345_v31 }
 0x9dd   : > { %v3110_v51 = vpop.f32.mrf.mxu1 }
 0xa47   : > { %v1676_v52 = vpop.xlane.xlu0 %1675 }
 0xa48   : > { %3296 = vrcp.f32 %v1676_v52 }
 0xa4b   : > { %v1680_v53 = vpop.permute.xlu0 %1679 }
 0xa4c   : > { %3117 = vmatpush3.msra.mxu1 %v1680_v53 }
 0xa4d   : > { %3126 = vmatprep.subr.mxu1 %v3442_v0 }
 0xa55   : > { %v3297_v54 = vpop.eup %3296 }
 0xa56   : > { %v1678_v56 = vmul.f32 %v3297_v54, %v3295_v47 }
 0xa58   : > { %3119 = vmatmul.mubr.msk.f32.vlgmr.msra.gmra.mxu1 %vm696_vm5, %v1678_v56 }
 0xa59   : > { %3127 = vmatpush3.xpose.msk.msra.mxu1 %vm619_vm2, %v1835_v55  ;;  %3128 = vmatprep.mubr.msk.f32.mxu1 %vm3443_vm0, %v3442_v0 }
 0xa5a   : > { %3136 = vmatprep.subr.mxu1 %v3442_v0 }
 0xa5c   : > { %3129 = vmatmul.mubr.msk.f32.vlgmr.msra.gmra.mxu1 %vm619_vm2, %v1833_v57 }
 0xa5d   : > { %3138 = vmatprep.mubr.msk.f32.mxu1 %vm3443_vm0, %v3442_v0  ;;  %3137 = vmatpush3.msk.msra.mxu1 %vm955_vm6, %v1998_v59 }
 0xa5e   : > { %3146 = vmatprep.subr.mxu1 %v3442_v0 }
 0xb18   : > { %v1751_v60 = vpop.f32.mrf.mxu1 }
 0xb19   : > { %3124 = vmatmul.mubr.msk.f32.vlgmr.msra.gmra.mxu0 %vm619_vm2, %v1751_v60 }
 0xb1a   : > { %v3120_v61 = vpop.f32.mrf.mxu1  ;;  %3133 = vmatprep.mubr.msk.f32.mxu0 %vm3443_vm0, %v3442_v0 }
 0xb1b   : > { %v2960_v61 = vld [vmem:[%s4040_s5] ss:$0 sm:$0xff] }
 0xb1c   : > { %v1906_v62 = vpop.f32.mrf.mxu1 }
 0xb1d   : > { %v1910_v63 = vsel %vm611_vm4, -65504.0, %v1906_v62 }
 0xb1e   : > { %v3130_v1 = vpop.f32.mrf.mxu1  ;;  %v1911_v2 = vsel %vm696_vm5, %v1910_v63, -inf }
 0xb1f   : > { %1912 = vmax.xlane.f32.xlu0 %v1911_v2 }
 0xb35   : > { %1922 = vrot.lane.b32.xlu0 %v3731_v8, %s3461_s27 }
 0xb39   : > { %2075 = vrot.lane.b32.xlu0 %v3735_v10, %s3462_s21  ;;  %s4078_s21 = sld [smem:[#allocation18_spill]] }
 0xba8   : > { %v1913_v3 = vpop.xlane.xlu0 %1912 }
 0xba9   : > { %v1914_v4 = vsub.f32 %v1910_v63, %v1913_v3 }
 0xbab   : > { %v1915_v6 = vmul.f32 1.442695, %v1914_v4 }
 0xbac   : > { %v1923_v7 = vpop.permute.xlu0 %1922 }
 0xbad   : > { %3298 = vpow2.f32 %v1915_v6  ;;  %3132 = vmatpush3.msra.mxu0 %v1923_v7 }
 0xbae   : > { %3141 = vmatprep.subr.mxu0 %v3442_v0 }
 0xbb0   : > { %v2076_v19 = vpop.permute.xlu0 %2075 }
 0xbba   : > { %v3299_v9 = vpop.eup %3298 }
 0xbbb   : > { %v1917_v11 = vsel %vm696_vm5, %v3299_v9, 0.0 }
 0xbbc   : > { %1918 = vadd.xlane.f32.xlu1 %v1917_v11 }
 0xbcd   : > { %2077 = vrot.lane.b32.xlu1 %v3731_v8, %s3463_s15  ;;  %s2817_s15 = scalar_lea.hbm %s4078_s21, %s2970_s23 }
 0xbd9   : > { %v1827_v12 = vpop.f32.mrf.mxu0 }
 0xbda   : > { %v1831_v13 = vadd.f32 %v1827_v12, %v1588_v50  ;;  %v2603_v12 = vld [vmem:[%s4043_s8 + $0x18] sm:$0xff] }
 0xbdb   : > { %v3125_v14 = vpop.f32.mrf.mxu0 }
 0xbdc   : > { %v2600_v14 = vld [vmem:[%s4043_s8] sm:$0xff] }
 0xc45   : > { %v1919_v15 = vpop.xlane.xlu1 %1918 }
 0xc46   : > { %3300 = vrcp.f32 %v1919_v15  ;;  %v2692_v15 = vld [vmem:[%s4045_s10 + $0x38] sm:$0xff] }
 0xc49   : > { %v2078_v18 = vpop.permute.xlu1 %2077 }
 0xc53   : > { %v3301_v16 = vpop.eup %3300 }
 0xc54   : > { %v1921_v17 = vmul.f32 %v3301_v16, %v3299_v9  ;;  %v2691_v16 = vld [vmem:[%s4045_s10 + $0x30] sm:$0xff] }
 0xc56   : > { %3134 = vmatmul.mubr.msk.f32.vlgmr.msra.gmra.mxu0 %vm696_vm5, %v1921_v17  ;;  %v2690_v17 = vld [vmem:[%s4045_s10 + $0x28] sm:$0xff] }
 0xc57   : > { %3142 = vmatpush3.xpose.msk.msra.mxu0 %vm619_vm2, %v2078_v18  ;;  %3143 = vmatprep.mubr.msk.f32.mxu0 %vm3443_vm0, %v3442_v0  ;;  %v2689_v18 = vld [vmem:[%s4045_s10 + $0x20] sm:$0xff] }
 0xc58   : > { %3151 = vmatprep.subr.mxu0 %v3442_v0 }
 0xc5a   : > { %3144 = vmatmul.mubr.msk.f32.vlgmr.msra.gmra.mxu0 %vm619_vm2, %v2076_v19  ;;  %v2688_v19 = vld [vmem:[%s4045_s10 + $0x18] sm:$0xff] }
 0xc5b   : > { %3153 = vmatprep.mubr.msk.f32.mxu0 %vm3443_vm0, %v3442_v0  ;;  %3152 = vmatpush3.msk.msra.mxu0 %vm955_vm6, %v615_v40 }
 0xc5c   : > { %3161 = vmatprep.subr.mxu0 %v3442_v0 }
 0xd16   : > { %v1994_v21 = vpop.f32.mrf.mxu0 }
 0xd17   : > { %3139 = vmatmul.mubr.msk.f32.vlgmr.msra.gmra.mxu1 %vm619_vm2, %v1994_v21 }
 0xd18   : > { %v3135_v22 = vpop.f32.mrf.mxu0  ;;  %3148 = vmatprep.mubr.msk.f32.mxu1 %vm3443_vm0, %v3442_v0 }
 0xd1a   : > { %v2149_v23 = vpop.f32.mrf.mxu0 }
 0xd1b   : > { %v2153_v24 = vsel %vm611_vm4, -65504.0, %v2149_v23 }
 0xd1c   : > { %v3145_v25 = vpop.f32.mrf.mxu0  ;;  %v2154_v26 = vsel %vm696_vm5, %v2153_v24, -inf }
 0xd1d   : > { %2155 = vmax.xlane.f32.xlu1 %v2154_v26  ;;  %v2961_v25 = vld [vmem:[%s4041_s6] ss:$0 sm:$0xff] }
 0xd2e   : > { %2320 = vrot.lane.b32.xlu1 %v3731_v8, %s3464_s18  ;;  %s2806_s18 = scalar_lea.sflag [#allocation4], %s3684_s0 }
 0xd32   : > { %2318 = vrot.lane.b32.xlu1 %v3735_v10, %s3465_s26  ;;  %s3370_s26 = scalar_lea.vmem %s2820_s24, 128 }
 0xd33   : > { %p3371_p13 = scmp.ne.s32.totalorder %s2820_s24, %s3370_s26 }
 0xd35   : > { %p3372_p7 = pnand %p3371_p13, %p4079_p3 }
 0xd37   : > { %p3373_p8 = pneg %p3372_p7 }
 0xda6   : > { %v2156_v27 = vpop.xlane.xlu1 %2155 }
 0xda7   : > { %v2157_v28 = vsub.f32 %v2153_v24, %v2156_v27  ;;  %v2962_v27 = vld [vmem:[%s4042_s7] ss:$0 sm:$0xff] }
 0xda9   : > { %v2158_v29 = vmul.f32 1.442695, %v2157_v28 }
 0xdaa   : > { %v2321_v37 = vpop.permute.xlu1 %2320 }
 0xdab   : > { %3302 = vpow2.f32 %v2158_v29 }
 0xdae   : > { %v2319_v39 = vpop.permute.xlu1 %2318 }
 0xdb8   : > { %v3303_v30 = vpop.eup %3302 }
 0xdb9   : > { %v2160_v31 = vsel %vm696_vm5, %v3303_v30, 0.0 }
 0xdba   : > { %2161 = vadd.xlane.f32.xlu0 %v2160_v31  ;;  %v2686_v31 = vld [vmem:[%s4045_s10 + $0x8] sm:$0xff] }
 0xdd0   : > { %2165 = vrot.lane.b32.xlu0 %v3731_v8, %s3466_s14  ;;  %s3468_s14 = smov [#allocation7]  }
 0xdd1   : > { %s3374_s17 = sshll.u32 %s3468_s14, 4  ;;  %s3375_s17 = int_to_ptr.vmem [resolvable:$false] %s3374_s17 }
 0xdd2   : > { %s3376_s29 = scalar_lea.vmem %s3375_s17, 256  ;;  %p3377_p10 = scmp.lt.s32.totalorder %s2820_s24, %s3375_s17 }
 0xdd3   : > { %p3378_p2 = scmp.lt.s32.totalorder %s3376_s29, %s3370_s26 }
 0xdd5   : > { %p3379_p4 = por %p3378_p2, %p3377_p10 }
 0xdd7   : > { %v2070_v32 = vpop.f32.mrf.mxu1  ;;  %p3380_p5 = pnand %p3379_p4, %p3373_p8 }
 0xdd8   : > { %v2074_v33 = vadd.f32 %v2070_v32, %v1831_v13  ;;  %v2602_v13 = vld [vmem:[%s4043_s8 + $0x10] sm:$0xff]  ;;  %v2685_v32 = vld [vmem:[%s4045_s10] sm:$0xff] }
 0xdd9   : > { %v3140_v34 = vpop.f32.mrf.mxu1 }
 0xe43   : > { %v2162_v35 = vpop.xlane.xlu0 %2161 }
 0xe44   : > { %3304 = vrcp.f32 %v2162_v35 }
 0xe47   : > { %v2166_v36 = vpop.permute.xlu0 %2165 }
 0xe48   : > { %3147 = vmatpush3.msra.mxu1 %v2166_v36 }
 0xe49   : > { %3156 = vmatprep.subr.mxu1 %v3442_v0 }
 0xe51   : > { %v3305_v10 = vpop.eup %3304 }
 0xe52   : > { %v2164_v38 = vmul.f32 %v3305_v10, %v3303_v30  ;;  %v2687_v30 = vld [vmem:[%s4045_s10 + $0x10] sm:$0xff] }
 0xe54   : > { %3149 = vmatmul.mubr.msk.f32.vlgmr.msra.gmra.mxu1 %vm696_vm5, %v2164_v38 }
 0xe55   : > { %3157 = vmatpush3.xpose.msk.msra.mxu1 %vm619_vm2, %v2321_v37  ;;  %3158 = vmatprep.mubr.msk.f32.mxu1 %vm3443_vm0, %v3442_v0  ;;  %v2965_v37 = vld [vmem:[%s4046_s11] ss:$0 sm:$0xff] }
 0xe56   : > { %3166 = vmatprep.subr.mxu1 %v3442_v0 }
 0xe58   : > { %3159 = vmatmul.mubr.msk.f32.vlgmr.msra.gmra.mxu1 %vm619_vm2, %v2319_v39 }
 0xe59   : > { %3168 = vmatprep.mubr.msk.f32.mxu1 %vm3443_vm0, %v3442_v0  ;;  %3167 = vmatpush3.msk.msra.mxu1 %vm955_vm6, %v2484_v41 }
 0xe5a   : > { %3182 = vmatprep.subr.mxu1 %v3442_v0 }
 0xf14   : > { %v2237_v42 = vpop.f32.mrf.mxu1 }
 0xf15   : > { %3154 = vmatmul.mubr.msk.f32.vlgmr.msra.gmra.mxu0 %vm619_vm2, %v2237_v42 }
 0xf16   : > { %v3150_v43 = vpop.f32.mrf.mxu1  ;;  %3163 = vmatprep.mubr.msk.f32.mxu0 %vm3443_vm0, %v3442_v0 }
 0xf18   : > { %v2392_v44 = vpop.f32.mrf.mxu1 }
 0xf19   : > { %v2396_v45 = vsel %vm611_vm4, -65504.0, %v2392_v44 }
 0xf1a   : > { %v3160_v46 = vpop.f32.mrf.mxu1  ;;  %v2397_v47 = vsel %vm696_vm5, %v2396_v45, -inf }
 0xf1b   : > { %2398 = vmax.xlane.f32.xlu0 %v2397_v47 }
 0xf31   : > { %2408 = vrot.lane.b32.xlu0 %v3731_v8, %s3467_s19  ;;  %s4077_s19 = sld [smem:[#allocation17_spill]] }
 0xfa4   : > { %v2399_v48 = vpop.xlane.xlu0 %2398 }
 0xfa5   : > { %v2400_v49 = vsub.f32 %v2396_v45, %v2399_v48 }
 0xfa7   : > { %v2401_v50 = vmul.f32 1.442695, %v2400_v49 }
 0xfa8   : > { %v2409_v51 = vpop.permute.xlu0 %2408 }
 0xfa9   : > { %3306 = vpow2.f32 %v2401_v50  ;;  %3162 = vmatpush3.msra.mxu0 %v2409_v51  ;;  %v2967_v51 = vld [vmem:[%s4047_s12] ss:$0 sm:$0xff] }
 0xfaa   : > { %3171 = vmatprep.subr.mxu0 %v3442_v0 }
 0xfb6   : > { %v3307_v52 = vpop.eup %3306 }
 0xfb7   : > { %v2403_v53 = vsel %vm696_vm5, %v3307_v52, 0.0 }
 0xfb8   : > { %2404 = vadd.xlane.f32.xlu1 %v2403_v53  ;;  %v2968_v53 = vld [vmem:[%s4077_s19] ss:$0 sm:$0xff] }
 0xfd5   : > { %v2313_v20 = vpop.f32.mrf.mxu0 }
 0xfd6   : > { %v2317_v54 = vadd.f32 %v2313_v20, %v2074_v33  ;;  %v2963_v33 = vld [vmem:[%s4044_s9] ss:$0 sm:$0xff] }
 0xfd7   : > { %v3155_v55 = vpop.f32.mrf.mxu0 }
0x1041   : > { %v2405_v56 = vpop.xlane.xlu1 %2404 }
0x1042   : > { %3308 = vrcp.f32 %v2405_v56 }
0x104f   : > { %v3309_v57 = vpop.eup %3308 }
0x1050   : > { %v2407_v58 = vmul.f32 %v3309_v57, %v3307_v52 }
0x1052   : > { %3164 = vmatmul.mubr.msk.f32.vlgmr.msra.gmra.mxu0 %vm696_vm5, %v2407_v58 }
0x1053   : > { %3179 = vmatprep.mubr.msk.f32.mxu0 %vm3443_vm0, %v3442_v0  ;;  %3172 = vmatpush3.msra.mxu0 %v2603_v12 }
0x1054   : > { %3173 = vmatprep.subr.mxu0 %v3442_v0 }
0x1055   : > { %3174 = vmatpush3.msra.mxu0 %v2602_v13 }
0x1056   : > { %3175 = vmatprep.subr.mxu0 %v3442_v0 }
0x1112   : > { %v2480_v8 = vpop.f32.mrf.mxu0 }
0x1113   : > { %3169 = vmatmul.mubr.msk.f32.vlgmr.msra.gmra.mxu1 %vm619_vm2, %v2480_v8 }
0x1114   : > { %v3165_v59 = vpop.f32.mrf.mxu0  ;;  %3198 = vmatprep.mubr.msk.f32.mxu1 %vm3443_vm0, %v3442_v0  ;;  %3183 = vmatpush3.msra.mxu1 %v2692_v15 }
0x1115   : > { %3184 = vmatprep.subr.mxu1 %v3442_v0 }
0x1116   : > { %3185 = vmatpush3.msra.mxu1 %v2691_v16 }
0x1117   : > { %3186 = vmatprep.subr.mxu1 %v3442_v0 }
0x1118   : > { %3187 = vmatpush3.msra.mxu1 %v2690_v17 }
0x1119   : > { %3188 = vmatprep.subr.mxu1 %v3442_v0 }
0x111a   : > { %3189 = vmatpush3.msra.mxu1 %v2689_v18 }
0x111b   : > { %3190 = vmatprep.subr.mxu1 %v3442_v0 }
0x111c   : > { %3191 = vmatpush3.msra.mxu1 %v2688_v19 }
0x111d   : > { %3192 = vmatprep.subr.mxu1 %v3442_v0 }
0x111e   : > { %3193 = vmatpush3.msra.mxu1 %v2687_v30 }
0x111f   : > { %3194 = vmatprep.subr.mxu1 %v3442_v0 }
0x1120   : > { %3195 = vmatpush3.msra.mxu1 %v2686_v31 }
0x1121   : > { %3196 = vmatprep.subr.mxu1 %v3442_v0 }
0x1122   : > { %3197 = vmatpush3.msra.mxu1 %v2685_v32 }
0x11d3   : > { %v2556_v60 = vpop.f32.mrf.mxu1 }
0x11d4   : > { %v2560_v62 = vadd.f32 %v2556_v60, %v2317_v54 }
0x11d5   : > { %v3170_v63 = vpop.f32.mrf.mxu1 }
0x11d6   : > { %v2568_v1 = vadd.f32 %v2960_v61, %v2560_v62 }
0x11d8   : > { %v2569_v2 = vadd.f32 %v2568_v1, %v3720_v5  ;;  %v2601_v5 = vld [vmem:[%s4043_s8 + $0x8] sm:$0xff] }
0x11d9   : > { %3176 = vmatpush3.msra.mxu0 %v2601_v5 }
0x11da   : > { %v2570_v3 = vsel %vm530_vm1, %v2569_v2, 0.0  ;;  %3177 = vmatprep.subr.mxu0 %v3442_v0 }
0x11db   : > { %2571 = vadd.xlane.f32.xlu1 %v2570_v3  ;;  %3178 = vmatpush3.msra.mxu0 %v2600_v14 }
0x1264   : > { %v2572_v4 = vpop.xlane.xlu1 %2571 }
0x1265   : > { %v2574_v6 = vmul.f32 0.03125, %v2572_v4 }
0x1267   : > { %v2575_v7 = vsub.f32 %v2569_v2, %v2574_v6 }
0x1269   : > { %v2576_v9 = vmul.f32 %v2575_v7, %v2575_v7 }
0x126b   : > { %v2577_v11 = vsel %vm530_vm1, %v2576_v9, 0.0 }
0x126c   : > { %2578 = vadd.xlane.f32.xlu1 %v2577_v11 }
0x12f5   : > { %v2579_v21 = vpop.xlane.xlu1 %2578 }
0x12f6   : > { %v2580_v22 = vmul.f32 0.03125, %v2579_v21 }
0x12f8   : > { %v2581_v23 = vadd.f32 1e-05, %v2580_v22 }
0x12fa   : > { %3310 = vrsqrt.f32 %v2581_v23 }
0x1307   : > { %v3311_v24 = vpop.eup %3310 }
0x1308   : > { %v2583_v26 = vmul.f32 %v3311_v24, %v2575_v7 }
0x130a   : > { %v2591_v28 = vmul.f32 %v2961_v25, %v2583_v26 }
0x130c   : > { %v2599_v29 = vadd.f32 %v2962_v27, %v2591_v28 }
0x130e   : > { %3180 = vmatmul.mubr.msk.f32.vlgmr.msra.gmra.mxu0 %vm530_vm1, %v2599_v29 }
0x13ce   : > { %v2680_v34 = vpop.f32.mrf.mxu0 }
0x13cf   : > { %v2681_v35 = vadd.f32 %v2963_v33, %v2680_v34 }
0x13d0   : > { %v3181_v36 = vpop.f32.mrf.mxu0 }
0x13d1   : > { %v2684_v10 = vmax.f32 %v2681_v35, 0.0 }
0x13d3   : > { %3199 = vmatmul.mubr.msk.f32.vlgmr.msra.gmra.mxu1 %vm2700_vm7, %v2684_v10 }
0x1493   : > { %v2770_v38 = vpop.f32.mrf.mxu1 }
0x1494   : > { %v2771_v39 = vadd.f32 %v2965_v37, %v2770_v38 }
0x1495   : > { %v3200_v40 = vpop.f32.mrf.mxu1 }
0x1496   : > { %v2774_v41 = vadd.f32 %v2771_v39, %v2599_v29 }
0x1498   : > { %v2775_v0 = vsel %vm530_vm1, %v2774_v41, 0.0 }
0x1499   : > { %2776 = vadd.xlane.f32.xlu1 %v2775_v0 }
0x1522   : > { %v2777_v42 = vpop.xlane.xlu1 %2776 }
0x1523   : > { %v2778_v43 = vmul.f32 0.03125, %v2777_v42 }
0x1525   : > { %v2779_v44 = vsub.f32 %v2774_v41, %v2778_v43 }
0x1527   : > { %v2780_v45 = vmul.f32 %v2779_v44, %v2779_v44 }
0x1529   : > { %v2781_v46 = vsel %vm530_vm1, %v2780_v45, 0.0 }
0x152a   : > { %2782 = vadd.xlane.f32.xlu1 %v2781_v46 }
0x15b3   : > { %v2783_v47 = vpop.xlane.xlu1 %2782 }
0x15b4   : > { %v2784_v48 = vmul.f32 0.03125, %v2783_v47 }
0x15b6   : > { %v2785_v49 = vadd.f32 1e-05, %v2784_v48 }
0x15b8   : > { %3312 = vrsqrt.f32 %v2785_v49 }
0x15c5   : > { %v3313_v50 = vpop.eup %3312 }
0x15c6   : > { %v2787_v52 = vmul.f32 %v3313_v50, %v2779_v44 }
0x15c8   : > { %v2795_v20 = vmul.f32 %v2967_v51, %v2787_v52 }
0x15ca   : > { %v2803_v54 = vadd.f32 %v2968_v53, %v2795_v20 }
0x15cc   : > { %2804 = vst.msk [vmem:[%s516_s13] sm:$0xff] %vm530_vm1, %v2803_v54 }
0x15cd   : > { %3383 = shalt.err (!%p3380_p5)
}
0x15ce   : > { %s3384_s20 = scalar_lea.hbm %s2817_s15, 128  ;;  %s3388_s19 = scalar_lea.hbm %s4078_s21, 256 }
0x15cf   : > { %p3385_p9 = scmp.ne.s32.totalorder %s2817_s15, %s3384_s20  ;;  %p3389_p12 = scmp.lt.s32.totalorder %s2817_s15, %s4078_s21 }
0x15d0   : > { %p3390_p1 = scmp.lt.s32.totalorder %s3388_s19, %s3384_s20 }
0x15d1   : > { %p3386_p0 = pnand %p3385_p9, %p4079_p3 }
0x15d2   : > { %p3391_p6 = por %p3390_p1, %p3389_p12 }
0x15d3   : > { %p3387_p11 = pneg %p3386_p0 }
0x15d5   : > { %p3392_p13 = pnand %p3391_p6, %p3387_p11 }
0x15d7   : > { %3395 = shalt.err (!%p3392_p13)
}
0x15d8   : > { %3205 = dma.vmem_to_hbm [thread:$0]  (%p4079_p3), %s2820_s24, 128, %s2817_s15, %s2806_s18  }
0x15d9 PF: > { %s4080_s28 = sld [smem:[#allocation11_spill]]  ;;  %p4083_p8 = scmp.ge.s32.totalorder %s3438_s16, 2 }
0x15da   : > { %s4081_s27 = sld [smem:[#allocation15_spill]] }
0x15df   : > { %s2831_s26 = sand.u32 1, %s4080_s28  }
0x15e0   : > { %p4082_p7 = scmp.ne.s32.totalorder %s4081_s27, 0  ;;  %s2832_s14 = scalar_lea.sflag [#allocation4], %s2831_s26 }
0x15e2   : > { %p3215_p10 = pnand %p4083_p8, %p4082_p7 }
0x15e4   : > { %p3216_p2 = pneg %p3215_p10 }
0x15e6   : > { %3421 = dma.done.wait (%p3216_p2), %s2832_s14, 128  }
0x15e7   : > { %3423 = vsyncadd (%p3216_p2), %s2832_s14, 4294967168  ;;  %s4084_s16 = sld [smem:[#allocation13_spill]]  ;;  %s4087_s29 = smov %s3430_s30 }
0x15e8   : > { %s4085_s17 = sld [smem:[#allocation12_spill]] }
0x15e9   : > { %s4086_s15 = sld [smem:[#allocation14_spill]] }
0x15ed   : > { %p30_p4 = scmp.ge.s32.totalorder %s4084_s16, 4  }
0x15ee   : > { %s4088_s30 = smov %s4085_s17 }
0x15ef   :  { %32 = sbr.rel (!%p30_p4) target bundleno = 11 (0xb), region = 134 }
0x15f4   :  { %2837 = vsyncpa [#allocation3], 1 }
0x15f5   :  { %2839 = vsyncpa [#allocation3 + $0x1], 1 }
0x15f6   :  { %2840 = vsyncpa [#allocation6], 1 }
0x15f7   :  { %2842 = vsyncpa [#allocation6 + $0x1], 1 }
0x15f8   :  { %2843 = vsyncpa [#allocation4], 1 }
0x15f9   :  { %2845 = vsyncpa [#allocation4 + $0x1], 1 }

</bundles_post_ra>
